<compile_context>
chip_gen: v6e
topology: v6e:2x2x1
jax: 0.10.0
libtpu: 0.0.40
codegen_flags: <defaults>
</compile_context>

<pallas_src>
import numpy as np
import jax
import jax.numpy as jnp
from jax.experimental import pallas as pl
from jax.experimental.pallas import tpu as pltpu


# ----------------------------------------------------------------------------
# Static network geometry (LeNet on CIFAR-10, matching the PyTorch module)
# ----------------------------------------------------------------------------
_K = 5                                                   # conv kernel size

# conv1: 3x32x32 -> 6x28x28 -> pool -> 6x14x14
_C1_IN, _C1_OUT, _C1_H, _C1_W = 3, 6, 32, 32
_C1_HO, _C1_WO = _C1_H - _K + 1, _C1_W - _K + 1          # 28, 28
_C1_HP, _C1_WP = _C1_HO // 2, _C1_WO // 2                # 14, 14
_C1_M = _C1_OUT * _C1_WP                                 # 84

# conv2: 6x14x14 -> 16x10x10 -> pool -> 16x5x5
_C2_IN, _C2_OUT, _C2_H, _C2_W = 6, 16, _C1_HP, _C1_WP    # 6, 16, 14, 14
_C2_HO, _C2_WO = _C2_H - _K + 1, _C2_W - _K + 1          # 10, 10
_C2_HP, _C2_WP = _C2_HO // 2, _C2_WO // 2                # 5, 5
_C2_M = _C2_OUT * _C2_WP                                 # 80

_FC_IN = _C2_OUT * _C2_HP * _C2_WP                       # 400

# Static per-tap lhs slices of the per-image input tile: (row0, nrows, col0, ncols),
# one per leading index of the banded weight tensors.
#   conv1 input layout: [Cin*H, W] (free reshape of NCHW)  -> taps over (cin, i)
_TAPS1 = tuple((cin * _C1_H + i, _C1_HO, 0, _C1_W)
               for cin in range(_C1_IN) for i in range(_K))
#   conv2 input layout: [H, Cin*W] (what kernel 1 stores)  -> taps over i only
_TAPS2 = tuple((i, _C2_HO, 0, _C2_IN * _C2_W) for i in range(_K))


def _parallel_1d_params():
    cp = getattr(pltpu, "CompilerParams", None) or getattr(pltpu, "TPUCompilerParams", None)
    return cp(dimension_semantics=("parallel",)) if cp is not None else None


_PARALLEL_1D = _parallel_1d_params()


# ----------------------------------------------------------------------------
# Pallas kernels
# ----------------------------------------------------------------------------
def _make_conv_pool_kernel(taps):
    """conv(stride 1, valid) + bias + ReLU + 2x2 max-pool for ONE image.

    x_ref  : (1, R, C)   bf16 input tile (layout encoded by `taps`)
    te_ref : (T, K, M)   banded weights, even pooled-column parity (bf16)
    to_ref : (T, K, M)   banded weights, odd  pooled-column parity (bf16)
    she_ref: (Hp, Ho)    0/1 matrix selecting even conv rows (f32)
    sho_ref: (Hp, Ho)    0/1 matrix selecting odd  conv rows (f32)
    b_ref  : (1, M)      per-channel bias repeated over pooled width (f32)
    o_ref  : (1, Hp, M)  pooled output, layout [hp, cout*Wp + wp] (bf16)
    """

    def kernel(x_ref, te_ref, to_ref, she_ref, sho_ref, b_ref, o_ref):
        x = x_ref[0]                                       # [R, C] bf16
        acc_e = None
        acc_o = None
        for t, (r0, nr, c0, nc) in enumerate(taps):        # static unroll (5 or 15 taps)
            lhs = x[r0:r0 + nr, c0:c0 + nc]                # unit-stride static slice
            de = jnp.dot(lhs, te_ref[t], preferred_element_type=jnp.float32)
            do = jnp.dot(lhs, to_ref[t], preferred_element_type=jnp.float32)
            acc_e = de if acc_e is None else acc_e + de
            acc_o = do if acc_o is None else acc_o + do
        # max over the two pooled-column parities (folded into the banded weights)
        m = jnp.maximum(acc_e, acc_o)                      # [Ho, M] f32
        # max over the two pooled-row parities via tiny 0/1 selection matmuls
        pe = jnp.dot(she_ref[...], m, preferred_element_type=jnp.float32)
        po = jnp.dot(sho_ref[...], m, preferred_element_type=jnp.float32)
        pooled = jnp.maximum(pe, po)                       # [Hp, M] f32
        # bias + ReLU commute with the max (bias constant per channel, ReLU monotone)
        y = jnp.maximum(pooled + b_ref[...], 0.0)
        o_ref[0] = y.astype(o_ref.dtype)

    return kernel


def _fc_kernel(x_ref, w1_ref, b1_ref, w2_ref, b2_ref, w3_ref, b3_ref, o_ref):
    """Fused fc1 + ReLU + fc2 + ReLU + fc3; intermediates never leave VMEM."""
    x = x_ref[...]                                                       # [TM, 400] bf16
    h1 = jnp.dot(x, w1_ref[...], preferred_element_type=jnp.float32) + b1_ref[...]
    h1 = jnp.maximum(h1, 0.0).astype(jnp.bfloat16)                       # [TM, 120]
    h2 = jnp.dot(h1, w2_ref[...], preferred_element_type=jnp.float32) + b2_ref[...]
    h2 = jnp.maximum(h2, 0.0).astype(jnp.bfloat16)                       # [TM, 84]
    out = jnp.dot(h2, w3_ref[...], preferred_element_type=jnp.float32) + b3_ref[...]
    o_ref[...] = out.astype(o_ref.dtype)                                 # [TM, 10]


# ----------------------------------------------------------------------------
# pallas_call wrappers
# ----------------------------------------------------------------------------
def _conv_relu_pool(x, te, to, she, sho, brep, *, taps):
    n, r, c = x.shape
    t, kd, m = te.shape
    hp, ho = she.shape
    return pl.pallas_call(
        _make_conv_pool_kernel(taps),
        out_shape=jax.ShapeDtypeStruct((n, hp, m), jnp.bfloat16),
        grid=(n,),
        in_specs=[
            pl.BlockSpec((1, r, c), lambda i: (i, 0, 0)),
            pl.BlockSpec((t, kd, m), lambda i: (0, 0, 0)),
            pl.BlockSpec((t, kd, m), lambda i: (0, 0, 0)),
            pl.BlockSpec((hp, ho), lambda i: (0, 0)),
            pl.BlockSpec((hp, ho), lambda i: (0, 0)),
            pl.BlockSpec((1, m), lambda i: (0, 0)),
        ],
        out_specs=pl.BlockSpec((1, hp, m), lambda i: (i, 0, 0)),
        compiler_params=_PARALLEL_1D,
    )(x, te, to, she, sho, brep)


def _fc_stack(x, w1, b1, w2, b2, w3, b3):
    n, kin = x.shape
    n_out = w3.shape[1]
    tm = n if n <= 512 else 256                # rows per grid step; tiny net fits whole batch
    return pl.pallas_call(
        _fc_kernel,
        out_shape=jax.ShapeDtypeStruct((n, n_out), jnp.float32),
        grid=(pl.cdiv(n, tm),),
        in_specs=[
            pl.BlockSpec((tm, kin), lambda i: (i, 0)),
            pl.BlockSpec(w1.shape, lambda i: (0, 0)),
            pl.BlockSpec(b1.shape, lambda i: (0, 0)),
            pl.BlockSpec(w2.shape, lambda i: (0, 0)),
            pl.BlockSpec(b2.shape, lambda i: (0, 0)),
            pl.BlockSpec(w3.shape, lambda i: (0, 0)),
            pl.BlockSpec(b3.shape, lambda i: (0, 0)),
        ],
        out_specs=pl.BlockSpec((tm, n_out), lambda i: (i, 0)),
        compiler_params=_PARALLEL_1D,
    )(x, w1, b1, w2, b2, w3, b3)


# ----------------------------------------------------------------------------
# One-time parameter packing (all transposes / banded expansion hoisted here)
# ----------------------------------------------------------------------------
def _banded_weights(w_oihw, w_in, wp, parity):
    """G[cin, i, w, cout, b] = w[cout, cin, i, w - 2b - parity] (0 outside kernel)."""
    c_out, c_in, kh, kw = w_oihw.shape
    wi = np.arange(w_in).reshape(1, 1, w_in, 1, 1)
    bb = np.arange(wp).reshape(1, 1, 1, 1, wp)
    j = wi - (2 * bb + parity)
    valid = jnp.asarray((j >= 0) & (j < kw))
    jc = np.clip(j, 0, kw - 1)
    co = np.arange(c_out).reshape(1, 1, 1, c_out, 1)
    ci = np.arange(c_in).reshape(c_in, 1, 1, 1, 1)
    ki = np.arange(kh).reshape(1, kh, 1, 1, 1)
    g = w_oihw[co, ci, ki, jc]                         # [Cin, kh, W, Cout, Wp]
    return jnp.where(valid, g, 0.0)


def _row_select(hp, ho, parity):
    s = np.zeros((hp, ho), np.float32)
    s[np.arange(hp), 2 * np.arange(hp) + parity] = 1.0
    return jnp.asarray(s)


def prepare_params(params):
    bf16 = jnp.bfloat16
    p = {}

    # conv1: input layout [Cin*H, W] -> banded tensor indexed [(cin,i), w, (cout,b)]
    g0 = _banded_weights(params["conv1_w"], _C1_W, _C1_WP, 0)
    g1 = _banded_weights(params["conv1_w"], _C1_W, _C1_WP, 1)
    p["t1e"] = g0.reshape(_C1_IN * _K, _C1_W, _C1_M).astype(bf16)
    p["t1o"] = g1.reshape(_C1_IN * _K, _C1_W, _C1_M).astype(bf16)
    p["sh1e"] = _row_select(_C1_HP, _C1_HO, 0)
    p["sh1o"] = _row_select(_C1_HP, _C1_HO, 1)
    p["b1"] = jnp.repeat(params["conv1_b"], _C1_WP).reshape(1, _C1_M).astype(jnp.float32)

    # conv2: input layout [H, Cin*W] -> banded tensor indexed [i, (cin,w), (cout,b)]
    g0 = _banded_weights(params["conv2_w"], _C2_W, _C2_WP, 0)
    g1 = _banded_weights(params["conv2_w"], _C2_W, _C2_WP, 1)
    p["t2e"] = g0.transpose(1, 0, 2, 3, 4).reshape(_K, _C2_IN * _C2_W, _C2_M).astype(bf16)
    p["t2o"] = g1.transpose(1, 0, 2, 3, 4).reshape(_K, _C2_IN * _C2_W, _C2_M).astype(bf16)
    p["sh2e"] = _row_select(_C2_HP, _C2_HO, 0)
    p["sh2o"] = _row_select(_C2_HP, _C2_HO, 1)
    p["b2"] = jnp.repeat(params["conv2_b"], _C2_WP).reshape(1, _C2_M).astype(jnp.float32)

    # fc1: permute rows so it directly consumes kernel-2's [hp, (cout, wp)] layout
    # while matching torch's .view(-1, 400) (cout, hp, wp) flatten order.
    a_i, c_i, b_i = np.meshgrid(np.arange(_C2_HP), np.arange(_C2_OUT),
                                np.arange(_C2_WP), indexing="ij")
    perm = (c_i * (_C2_HP * _C2_WP) + a_i * _C2_WP + b_i).reshape(-1)
    p["w1"] = params["fc1_w"].T[perm, :].astype(bf16)          # [400, 120]
    p["fb1"] = params["fc1_b"].reshape(1, -1).astype(jnp.float32)
    p["w2"] = params["fc2_w"].T.astype(bf16)                   # [120, 84]
    p["fb2"] = params["fc2_b"].reshape(1, -1).astype(jnp.float32)
    p["w3"] = params["fc3_w"].T.astype(bf16)                   # [84, 10]
    p["fb3"] = params["fc3_b"].reshape(1, -1).astype(jnp.float32)
    return p


# ----------------------------------------------------------------------------
# Model: deterministic parameter init + forward pass
# ----------------------------------------------------------------------------
def init_params(key):
    def uniform_fan_in(k, shape, fan_in):
        bound = 1.0 / np.sqrt(float(fan_in))
        return jax.random.uniform(k, shape, jnp.float32, -bound, bound)

    ks = jax.random.split(key, 10)
    return {
        "conv1_w": uniform_fan_in(ks[0], (6, 3, 5, 5), 3 * 5 * 5),
        "conv1_b": uniform_fan_in(ks[1], (6,), 3 * 5 * 5),
        "conv2_w": uniform_fan_in(ks[2], (16, 6, 5, 5), 6 * 5 * 5),
        "conv2_b": uniform_fan_in(ks[3], (16,), 6 * 5 * 5),
        "fc1_w": uniform_fan_in(ks[4], (120, 16 * 5 * 5), 16 * 5 * 5),
        "fc1_b": uniform_fan_in(ks[5], (120,), 16 * 5 * 5),
        "fc2_w": uniform_fan_in(ks[6], (84, 120), 120),
        "fc2_b": uniform_fan_in(ks[7], (84,), 120),
        "fc3_w": uniform_fan_in(ks[8], (10, 84), 84),
        "fc3_b": uniform_fan_in(ks[9], (10,), 84),
    }


@jax.jit
def convnet_forward(prepped, x):
    # x: [N, 3, 32, 32] float32 (NCHW, as in PyTorch)
    n = x.shape[0]
    x1 = x.reshape(n, _C1_IN * _C1_H, _C1_W).astype(jnp.bfloat16)   # free, contiguous reshape
    a1 = _conv_relu_pool(x1, prepped["t1e"], prepped["t1o"], prepped["sh1e"],
                         prepped["sh1o"], prepped["b1"], taps=_TAPS1)   # [N, 14, 84]
    a2 = _conv_relu_pool(a1, prepped["t2e"], prepped["t2o"], prepped["sh2e"],
                         prepped["sh2o"], prepped["b2"], taps=_TAPS2)   # [N, 5, 80]
    xf = a2.reshape(n, _FC_IN)                                          # free reshape
    return _fc_stack(xf, prepped["w1"], prepped["fb1"], prepped["w2"],
                     prepped["fb2"], prepped["w3"], prepped["fb3"])     # [N, 10] f32


if __name__ == "__main__":
    # Input must be 3x32x32 so that the flatten to 16*5*5 = 400 is consistent.
    x = jax.random.normal(jax.random.PRNGKey(0), (2, 3, 32, 32), dtype=jnp.float32)
    params = init_params(jax.random.PRNGKey(1))
    prepped = prepare_params(params)
    out = jax.block_until_ready(convnet_forward(prepped, x))
    assert out.shape == (2, 10) and out.dtype == jnp.float32
    print("KERNEL_OK")
</pallas_src>

<mosaic_0001>
module attributes {stable_mosaic.version = 11 : i64} {
  func.func @kernel(%arg0: i32, %arg1: memref<1x14x84xbf16, #tpu.memory_space<vmem>>, %arg2: memref<5x84x80xbf16, #tpu.memory_space<vmem>>, %arg3: memref<5x84x80xbf16, #tpu.memory_space<vmem>>, %arg4: memref<5x10xf32, #tpu.memory_space<vmem>>, %arg5: memref<5x10xf32, #tpu.memory_space<vmem>>, %arg6: memref<1x80xf32, #tpu.memory_space<vmem>>, %arg7: memref<1x5x80xbf16, #tpu.memory_space<vmem>>) attributes {dimension_semantics = [#tpu.dimension_semantics<parallel>], iteration_bounds = array<i64: 2>, scalar_prefetch = 0 : i64, scratch_operands = 0 : i64, tpu.core_type = #tpu.core_type<tc>, window_params = [{transform_indices = @transform_0, window_bounds = array<i64: 1, 14, 84>}, {pipeline_mode = #tpu.pipeline_mode<synchronous>, transform_indices = @transform_1, window_bounds = array<i64: 5, 84, 80>}, {pipeline_mode = #tpu.pipeline_mode<synchronous>, transform_indices = @transform_2, window_bounds = array<i64: 5, 84, 80>}, {pipeline_mode = #tpu.pipeline_mode<synchronous>, transform_indices = @transform_3, window_bounds = array<i64: 5, 10>}, {pipeline_mode = #tpu.pipeline_mode<synchronous>, transform_indices = @transform_4, window_bounds = array<i64: 5, 10>}, {pipeline_mode = #tpu.pipeline_mode<synchronous>, transform_indices = @transform_5, window_bounds = array<i64: 1, 80>}, {transform_indices = @transform_6, window_bounds = array<i64: 1, 5, 80>}]} {
    %c0 = arith.constant 0 : index
    %c0_0 = arith.constant 0 : index
    %c0_1 = arith.constant 0 : index
    %0 = vector.load %arg1[%c0, %c0_0, %c0_1] : memref<1x14x84xbf16, #tpu.memory_space<vmem>>, vector<1x14x84xbf16>
    %1 = vector.shape_cast %0 : vector<1x14x84xbf16> to vector<14x84xbf16>
    %2 = vector.extract_strided_slice %1 {offsets = [0, 0], sizes = [10, 84], strides = [1, 1]} : vector<14x84xbf16> to vector<10x84xbf16>
    %c0_2 = arith.constant 0 : index
    %c0_3 = arith.constant 0 : index
    %c0_4 = arith.constant 0 : index
    %3 = vector.load %arg2[%c0_2, %c0_3, %c0_4] : memref<5x84x80xbf16, #tpu.memory_space<vmem>>, vector<1x84x80xbf16>
    %4 = vector.shape_cast %3 : vector<1x84x80xbf16> to vector<84x80xbf16>
    %cst = arith.constant dense<0.000000e+00> : vector<10x80xf32>
    %5 = tpu.matmul %2, %4, %cst {dimension_numbers = #tpu.dot_dimension_numbers<[1], [0], [0], [1], [0, 0, 1, 1], [], []>} : vector<10x84xbf16>, vector<84x80xbf16>, vector<10x80xf32> -> vector<10x80xf32>
    %c0_5 = arith.constant 0 : index
    %c0_6 = arith.constant 0 : index
    %c0_7 = arith.constant 0 : index
    %6 = vector.load %arg3[%c0_5, %c0_6, %c0_7] : memref<5x84x80xbf16, #tpu.memory_space<vmem>>, vector<1x84x80xbf16>
    %7 = vector.shape_cast %6 : vector<1x84x80xbf16> to vector<84x80xbf16>
    %cst_8 = arith.constant dense<0.000000e+00> : vector<10x80xf32>
    %8 = tpu.matmul %2, %7, %cst_8 {dimension_numbers = #tpu.dot_dimension_numbers<[1], [0], [0], [1], [0, 0, 1, 1], [], []>} : vector<10x84xbf16>, vector<84x80xbf16>, vector<10x80xf32> -> vector<10x80xf32>
    %9 = vector.extract_strided_slice %1 {offsets = [1, 0], sizes = [10, 84], strides = [1, 1]} : vector<14x84xbf16> to vector<10x84xbf16>
    %c1 = arith.constant 1 : index
    %c0_9 = arith.constant 0 : index
    %c0_10 = arith.constant 0 : index
    %10 = vector.load %arg2[%c1, %c0_9, %c0_10] : memref<5x84x80xbf16, #tpu.memory_space<vmem>>, vector<1x84x80xbf16>
    %11 = vector.shape_cast %10 : vector<1x84x80xbf16> to vector<84x80xbf16>
    %cst_11 = arith.constant dense<0.000000e+00> : vector<10x80xf32>
    %12 = tpu.matmul %9, %11, %cst_11 {dimension_numbers = #tpu.dot_dimension_numbers<[1], [0], [0], [1], [0, 0, 1, 1], [], []>} : vector<10x84xbf16>, vector<84x80xbf16>, vector<10x80xf32> -> vector<10x80xf32>
    %c1_12 = arith.constant 1 : index
    %c0_13 = arith.constant 0 : index
    %c0_14 = arith.constant 0 : index
    %13 = vector.load %arg3[%c1_12, %c0_13, %c0_14] : memref<5x84x80xbf16, #tpu.memory_space<vmem>>, vector<1x84x80xbf16>
    %14 = vector.shape_cast %13 : vector<1x84x80xbf16> to vector<84x80xbf16>
    %cst_15 = arith.constant dense<0.000000e+00> : vector<10x80xf32>
    %15 = tpu.matmul %9, %14, %cst_15 {dimension_numbers = #tpu.dot_dimension_numbers<[1], [0], [0], [1], [0, 0, 1, 1], [], []>} : vector<10x84xbf16>, vector<84x80xbf16>, vector<10x80xf32> -> vector<10x80xf32>
    %16 = arith.addf %5, %12 : vector<10x80xf32>
    %17 = arith.addf %8, %15 : vector<10x80xf32>
    %18 = vector.extract_strided_slice %1 {offsets = [2, 0], sizes = [10, 84], strides = [1, 1]} : vector<14x84xbf16> to vector<10x84xbf16>
    %c2 = arith.constant 2 : index
    %c0_16 = arith.constant 0 : index
    %c0_17 = arith.constant 0 : index
    %19 = vector.load %arg2[%c2, %c0_16, %c0_17] : memref<5x84x80xbf16, #tpu.memory_space<vmem>>, vector<1x84x80xbf16>
    %20 = vector.shape_cast %19 : vector<1x84x80xbf16> to vector<84x80xbf16>
    %cst_18 = arith.constant dense<0.000000e+00> : vector<10x80xf32>
    %21 = tpu.matmul %18, %20, %cst_18 {dimension_numbers = #tpu.dot_dimension_numbers<[1], [0], [0], [1], [0, 0, 1, 1], [], []>} : vector<10x84xbf16>, vector<84x80xbf16>, vector<10x80xf32> -> vector<10x80xf32>
    %c2_19 = arith.constant 2 : index
    %c0_20 = arith.constant 0 : index
    %c0_21 = arith.constant 0 : index
    %22 = vector.load %arg3[%c2_19, %c0_20, %c0_21] : memref<5x84x80xbf16, #tpu.memory_space<vmem>>, vector<1x84x80xbf16>
    %23 = vector.shape_cast %22 : vector<1x84x80xbf16> to vector<84x80xbf16>
    %cst_22 = arith.constant dense<0.000000e+00> : vector<10x80xf32>
    %24 = tpu.matmul %18, %23, %cst_22 {dimension_numbers = #tpu.dot_dimension_numbers<[1], [0], [0], [1], [0, 0, 1, 1], [], []>} : vector<10x84xbf16>, vector<84x80xbf16>, vector<10x80xf32> -> vector<10x80xf32>
    %25 = arith.addf %16, %21 : vector<10x80xf32>
    %26 = arith.addf %17, %24 : vector<10x80xf32>
    %27 = vector.extract_strided_slice %1 {offsets = [3, 0], sizes = [10, 84], strides = [1, 1]} : vector<14x84xbf16> to vector<10x84xbf16>
    %c3 = arith.constant 3 : index
    %c0_23 = arith.constant 0 : index
    %c0_24 = arith.constant 0 : index
    %28 = vector.load %arg2[%c3, %c0_23, %c0_24] : memref<5x84x80xbf16, #tpu.memory_space<vmem>>, vector<1x84x80xbf16>
    %29 = vector.shape_cast %28 : vector<1x84x80xbf16> to vector<84x80xbf16>
    %cst_25 = arith.constant dense<0.000000e+00> : vector<10x80xf32>
    %30 = tpu.matmul %27, %29, %cst_25 {dimension_numbers = #tpu.dot_dimension_numbers<[1], [0], [0], [1], [0, 0, 1, 1], [], []>} : vector<10x84xbf16>, vector<84x80xbf16>, vector<10x80xf32> -> vector<10x80xf32>
    %c3_26 = arith.constant 3 : index
    %c0_27 = arith.constant 0 : index
    %c0_28 = arith.constant 0 : index
    %31 = vector.load %arg3[%c3_26, %c0_27, %c0_28] : memref<5x84x80xbf16, #tpu.memory_space<vmem>>, vector<1x84x80xbf16>
    %32 = vector.shape_cast %31 : vector<1x84x80xbf16> to vector<84x80xbf16>
    %cst_29 = arith.constant dense<0.000000e+00> : vector<10x80xf32>
    %33 = tpu.matmul %27, %32, %cst_29 {dimension_numbers = #tpu.dot_dimension_numbers<[1], [0], [0], [1], [0, 0, 1, 1], [], []>} : vector<10x84xbf16>, vector<84x80xbf16>, vector<10x80xf32> -> vector<10x80xf32>
    %34 = arith.addf %25, %30 : vector<10x80xf32>
    %35 = arith.addf %26, %33 : vector<10x80xf32>
    %36 = vector.extract_strided_slice %1 {offsets = [4, 0], sizes = [10, 84], strides = [1, 1]} : vector<14x84xbf16> to vector<10x84xbf16>
    %c4 = arith.constant 4 : index
    %c0_30 = arith.constant 0 : index
    %c0_31 = arith.constant 0 : index
    %37 = vector.load %arg2[%c4, %c0_30, %c0_31] : memref<5x84x80xbf16, #tpu.memory_space<vmem>>, vector<1x84x80xbf16>
    %38 = vector.shape_cast %37 : vector<1x84x80xbf16> to vector<84x80xbf16>
    %cst_32 = arith.constant dense<0.000000e+00> : vector<10x80xf32>
    %39 = tpu.matmul %36, %38, %cst_32 {dimension_numbers = #tpu.dot_dimension_numbers<[1], [0], [0], [1], [0, 0, 1, 1], [], []>} : vector<10x84xbf16>, vector<84x80xbf16>, vector<10x80xf32> -> vector<10x80xf32>
    %c4_33 = arith.constant 4 : index
    %c0_34 = arith.constant 0 : index
    %c0_35 = arith.constant 0 : index
    %40 = vector.load %arg3[%c4_33, %c0_34, %c0_35] : memref<5x84x80xbf16, #tpu.memory_space<vmem>>, vector<1x84x80xbf16>
    %41 = vector.shape_cast %40 : vector<1x84x80xbf16> to vector<84x80xbf16>
    %cst_36 = arith.constant dense<0.000000e+00> : vector<10x80xf32>
    %42 = tpu.matmul %36, %41, %cst_36 {dimension_numbers = #tpu.dot_dimension_numbers<[1], [0], [0], [1], [0, 0, 1, 1], [], []>} : vector<10x84xbf16>, vector<84x80xbf16>, vector<10x80xf32> -> vector<10x80xf32>
    %43 = arith.addf %34, %39 : vector<10x80xf32>
    %44 = arith.addf %35, %42 : vector<10x80xf32>
    %45 = arith.maximumf %43, %44 : vector<10x80xf32>
    %c0_37 = arith.constant 0 : index
    %c0_38 = arith.constant 0 : index
    %46 = vector.load %arg4[%c0_37, %c0_38] : memref<5x10xf32, #tpu.memory_space<vmem>>, vector<5x10xf32>
    %cst_39 = arith.constant dense<0.000000e+00> : vector<5x80xf32>
    %47 = tpu.matmul %46, %45, %cst_39 {dimension_numbers = #tpu.dot_dimension_numbers<[1], [0], [0], [1], [0, 0, 1, 1], [], []>} : vector<5x10xf32>, vector<10x80xf32>, vector<5x80xf32> -> vector<5x80xf32>
    %c0_40 = arith.constant 0 : index
    %c0_41 = arith.constant 0 : index
    %48 = vector.load %arg5[%c0_40, %c0_41] : memref<5x10xf32, #tpu.memory_space<vmem>>, vector<5x10xf32>
    %cst_42 = arith.constant dense<0.000000e+00> : vector<5x80xf32>
    %49 = tpu.matmul %48, %45, %cst_42 {dimension_numbers = #tpu.dot_dimension_numbers<[1], [0], [0], [1], [0, 0, 1, 1], [], []>} : vector<5x10xf32>, vector<10x80xf32>, vector<5x80xf32> -> vector<5x80xf32>
    %50 = arith.maximumf %47, %49 : vector<5x80xf32>
    %c0_43 = arith.constant 0 : index
    %c0_44 = arith.constant 0 : index
    %51 = vector.load %arg6[%c0_43, %c0_44] : memref<1x80xf32, #tpu.memory_space<vmem>>, vector<1x80xf32>
    %52 = vector.broadcast %51 : vector<1x80xf32> to vector<5x80xf32>
    %53 = arith.addf %50, %52 : vector<5x80xf32>
    %cst_45 = arith.constant 0.000000e+00 : f32
    %54 = vector.broadcast %cst_45 : f32 to vector<5x80xf32>
    %55 = arith.maximumf %53, %54 : vector<5x80xf32>
    %56 = arith.truncf %55 : vector<5x80xf32> to vector<5x80xbf16>
    %c0_46 = arith.constant 0 : index
    %c0_47 = arith.constant 0 : index
    %c0_48 = arith.constant 0 : index
    %57 = vector.load %arg7[%c0_46, %c0_47, %c0_48] : memref<1x5x80xbf16, #tpu.memory_space<vmem>>, vector<1x5x80xbf16>
    %58 = vector.shape_cast %57 : vector<1x5x80xbf16> to vector<5x80xbf16>
    %59 = vector.shape_cast %56 : vector<5x80xbf16> to vector<1x5x80xbf16>
    tpu.vector_store %arg7[%c0_46, %c0_47, %c0_48], %59 {strides = array<i32>} : memref<1x5x80xbf16, #tpu.memory_space<vmem>>, vector<1x5x80xbf16>,
    return
  }
  func.func @transform_0(%arg0: i32) -> (i32, i32, i32) {
    %c0_i32 = arith.constant 0 : i32
    %c0_i32_0 = arith.constant 0 : i32
    %c0_i32_1 = arith.constant 0 : i32
    return %arg0, %c0_i32, %c0_i32_0 : i32, i32, i32
  }
  func.func @transform_1(%arg0: i32) -> (i32, i32, i32) {
    %c0_i32 = arith.constant 0 : i32
    %c0_i32_0 = arith.constant 0 : i32
    %c0_i32_1 = arith.constant 0 : i32
    %c0_i32_2 = arith.constant 0 : i32
    return %c0_i32, %c0_i32_0, %c0_i32_1 : i32, i32, i32
  }
  func.func @transform_2(%arg0: i32) -> (i32, i32, i32) {
    %c0_i32 = arith.constant 0 : i32
    %c0_i32_0 = arith.constant 0 : i32
    %c0_i32_1 = arith.constant 0 : i32
    %c0_i32_2 = arith.constant 0 : i32
    return %c0_i32, %c0_i32_0, %c0_i32_1 : i32, i32, i32
  }
  func.func @transform_3(%arg0: i32) -> (i32, i32) {
    %c0_i32 = arith.constant 0 : i32
    %c0_i32_0 = arith.constant 0 : i32
    %c0_i32_1 = arith.constant 0 : i32
    return %c0_i32, %c0_i32_0 : i32, i32
  }
  func.func @transform_4(%arg0: i32) -> (i32, i32) {
    %c0_i32 = arith.constant 0 : i32
    %c0_i32_0 = arith.constant 0 : i32
    %c0_i32_1 = arith.constant 0 : i32
    return %c0_i32, %c0_i32_0 : i32, i32
  }
  func.func @transform_5(%arg0: i32) -> (i32, i32) {
    %c0_i32 = arith.constant 0 : i32
    %c0_i32_0 = arith.constant 0 : i32
    %c0_i32_1 = arith.constant 0 : i32
    return %c0_i32, %c0_i32_0 : i32, i32
  }
  func.func @transform_6(%arg0: i32) -> (i32, i32, i32) {
    %c0_i32 = arith.constant 0 : i32
    %c0_i32_0 = arith.constant 0 : i32
    %c0_i32_1 = arith.constant 0 : i32
    return %arg0, %c0_i32, %c0_i32_0 : i32, i32, i32
  }
}

module attributes {stable_mosaic.version = 11 : i64} {
  func.func @kernel(%arg0: i32, %arg1: memref<1x96x32xbf16, #tpu.memory_space<vmem>>, %arg2: memref<15x32x84xbf16, #tpu.memory_space<vmem>>, %arg3: memref<15x32x84xbf16, #tpu.memory_space<vmem>>, %arg4: memref<14x28xf32, #tpu.memory_space<vmem>>, %arg5: memref<14x28xf32, #tpu.memory_space<vmem>>, %arg6: memref<1x84xf32, #tpu.memory_space<vmem>>, %arg7: memref<1x14x84xbf16, #tpu.memory_space<vmem>>) attributes {dimension_semantics = [#tpu.dimension_semantics<parallel>], iteration_bounds = array<i64: 2>, scalar_prefetch = 0 : i64, scratch_operands = 0 : i64, tpu.core_type = #tpu.core_type<tc>, window_params = [{transform_indices = @transform_0, window_bounds = array<i64: 1, 96, 32>}, {pipeline_mode = #tpu.pipeline_mode<synchronous>, transform_indices = @transform_1, window_bounds = array<i64: 15, 32, 84>}, {pipeline_mode = #tpu.pipeline_mode<synchronous>, transform_indices = @transform_2, window_bounds = array<i64: 15, 32, 84>}, {pipeline_mode = #tpu.pipeline_mode<synchronous>, transform_indices = @transform_3, window_bounds = array<i64: 14, 28>}, {pipeline_mode = #tpu.pipeline_mode<synchronous>, transform_indices = @transform_4, window_bounds = array<i64: 14, 28>}, {pipeline_mode = #tpu.pipeline_mode<synchronous>, transform_indices = @transform_5, window_bounds = array<i64: 1, 84>}, {transform_indices = @transform_6, window_bounds = array<i64: 1, 14, 84>}]} {
    %c0 = arith.constant 0 : index
    %c0_0 = arith.constant 0 : index
    %c0_1 = arith.constant 0 : index
    %0 = vector.load %arg1[%c0, %c0_0, %c0_1] : memref<1x96x32xbf16, #tpu.memory_space<vmem>>, vector<1x96x32xbf16>
    %1 = vector.shape_cast %0 : vector<1x96x32xbf16> to vector<96x32xbf16>
    %2 = vector.extract_strided_slice %1 {offsets = [0, 0], sizes = [28, 32], strides = [1, 1]} : vector<96x32xbf16> to vector<28x32xbf16>
    %c0_2 = arith.constant 0 : index
    %c0_3 = arith.constant 0 : index
    %c0_4 = arith.constant 0 : index
    %3 = vector.load %arg2[%c0_2, %c0_3, %c0_4] : memref<15x32x84xbf16, #tpu.memory_space<vmem>>, vector<1x32x84xbf16>
    %4 = vector.shape_cast %3 : vector<1x32x84xbf16> to vector<32x84xbf16>
    %cst = arith.constant dense<0.000000e+00> : vector<28x84xf32>
    %5 = tpu.matmul %2, %4, %cst {dimension_numbers = #tpu.dot_dimension_numbers<[1], [0], [0], [1], [0, 0, 1, 1], [], []>} : vector<28x32xbf16>, vector<32x84xbf16>, vector<28x84xf32> -> vector<28x84xf32>
    %c0_5 = arith.constant 0 : index
    %c0_6 = arith.constant 0 : index
    %c0_7 = arith.constant 0 : index
    %6 = vector.load %arg3[%c0_5, %c0_6, %c0_7] : memref<15x32x84xbf16, #tpu.memory_space<vmem>>, vector<1x32x84xbf16>
    %7 = vector.shape_cast %6 : vector<1x32x84xbf16> to vector<32x84xbf16>
    %cst_8 = arith.constant dense<0.000000e+00> : vector<28x84xf32>
    %8 = tpu.matmul %2, %7, %cst_8 {dimension_numbers = #tpu.dot_dimension_numbers<[1], [0], [0], [1], [0, 0, 1, 1], [], []>} : vector<28x32xbf16>, vector<32x84xbf16>, vector<28x84xf32> -> vector<28x84xf32>
    %9 = vector.extract_strided_slice %1 {offsets = [1, 0], sizes = [28, 32], strides = [1, 1]} : vector<96x32xbf16> to vector<28x32xbf16>
    %c1 = arith.constant 1 : index
    %c0_9 = arith.constant 0 : index
    %c0_10 = arith.constant 0 : index
    %10 = vector.load %arg2[%c1, %c0_9, %c0_10] : memref<15x32x84xbf16, #tpu.memory_space<vmem>>, vector<1x32x84xbf16>
    %11 = vector.shape_cast %10 : vector<1x32x84xbf16> to vector<32x84xbf16>
    %cst_11 = arith.constant dense<0.000000e+00> : vector<28x84xf32>
    %12 = tpu.matmul %9, %11, %cst_11 {dimension_numbers = #tpu.dot_dimension_numbers<[1], [0], [0], [1], [0, 0, 1, 1], [], []>} : vector<28x32xbf16>, vector<32x84xbf16>, vector<28x84xf32> -> vector<28x84xf32>
    %c1_12 = arith.constant 1 : index
    %c0_13 = arith.constant 0 : index
    %c0_14 = arith.constant 0 : index
    %13 = vector.load %arg3[%c1_12, %c0_13, %c0_14] : memref<15x32x84xbf16, #tpu.memory_space<vmem>>, vector<1x32x84xbf16>
    %14 = vector.shape_cast %13 : vector<1x32x84xbf16> to vector<32x84xbf16>
    %cst_15 = arith.constant dense<0.000000e+00> : vector<28x84xf32>
    %15 = tpu.matmul %9, %14, %cst_15 {dimension_numbers = #tpu.dot_dimension_numbers<[1], [0], [0], [1], [0, 0, 1, 1], [], []>} : vector<28x32xbf16>, vector<32x84xbf16>, vector<28x84xf32> -> vector<28x84xf32>
    %16 = arith.addf %5, %12 : vector<28x84xf32>
    %17 = arith.addf %8, %15 : vector<28x84xf32>
    %18 = vector.extract_strided_slice %1 {offsets = [2, 0], sizes = [28, 32], strides = [1, 1]} : vector<96x32xbf16> to vector<28x32xbf16>
    %c2 = arith.constant 2 : index
    %c0_16 = arith.constant 0 : index
    %c0_17 = arith.constant 0 : index
    %19 = vector.load %arg2[%c2, %c0_16, %c0_17] : memref<15x32x84xbf16, #tpu.memory_space<vmem>>, vector<1x32x84xbf16>
    %20 = vector.shape_cast %19 : vector<1x32x84xbf16> to vector<32x84xbf16>
    %cst_18 = arith.constant dense<0.000000e+00> : vector<28x84xf32>
    %21 = tpu.matmul %18, %20, %cst_18 {dimension_numbers = #tpu.dot_dimension_numbers<[1], [0], [0], [1], [0, 0, 1, 1], [], []>} : vector<28x32xbf16>, vector<32x84xbf16>, vector<28x84xf32> -> vector<28x84xf32>
    %c2_19 = arith.constant 2 : index
    %c0_20 = arith.constant 0 : index
    %c0_21 = arith.constant 0 : index
    %22 = vector.load %arg3[%c2_19, %c0_20, %c0_21] : memref<15x32x84xbf16, #tpu.memory_space<vmem>>, vector<1x32x84xbf16>
    %23 = vector.shape_cast %22 : vector<1x32x84xbf16> to vector<32x84xbf16>
    %cst_22 = arith.constant dense<0.000000e+00> : vector<28x84xf32>
    %24 = tpu.matmul %18, %23, %cst_22 {dimension_numbers = #tpu.dot_dimension_numbers<[1], [0], [0], [1], [0, 0, 1, 1], [], []>} : vector<28x32xbf16>, vector<32x84xbf16>, vector<28x84xf32> -> vector<28x84xf32>
    %25 = arith.addf %16, %21 : vector<28x84xf32>
    %26 = arith.addf %17, %24 : vector<28x84xf32>
    %27 = vector.extract_strided_slice %1 {offsets = [3, 0], sizes = [28, 32], strides = [1, 1]} : vector<96x32xbf16> to vector<28x32xbf16>
    %c3 = arith.constant 3 : index
    %c0_23 = arith.constant 0 : index
    %c0_24 = arith.constant 0 : index
    %28 = vector.load %arg2[%c3, %c0_23, %c0_24] : memref<15x32x84xbf16, #tpu.memory_space<vmem>>, vector<1x32x84xbf16>
    %29 = vector.shape_cast %28 : vector<1x32x84xbf16> to vector<32x84xbf16>
    %cst_25 = arith.constant dense<0.000000e+00> : vector<28x84xf32>
    %30 = tpu.matmul %27, %29, %cst_25 {dimension_numbers = #tpu.dot_dimension_numbers<[1], [0], [0], [1], [0, 0, 1, 1], [], []>} : vector<28x32xbf16>, vector<32x84xbf16>, vector<28x84xf32> -> vector<28x84xf32>
    %c3_26 = arith.constant 3 : index
    %c0_27 = arith.constant 0 : index
    %c0_28 = arith.constant 0 : index
    %31 = vector.load %arg3[%c3_26, %c0_27, %c0_28] : memref<15x32x84xbf16, #tpu.memory_space<vmem>>, vector<1x32x84xbf16>
    %32 = vector.shape_cast %31 : vector<1x32x84xbf16> to vector<32x84xbf16>
    %cst_29 = arith.constant dense<0.000000e+00> : vector<28x84xf32>
    %33 = tpu.matmul %27, %32, %cst_29 {dimension_numbers = #tpu.dot_dimension_numbers<[1], [0], [0], [1], [0, 0, 1, 1], [], []>} : vector<28x32xbf16>, vector<32x84xbf16>, vector<28x84xf32> -> vector<28x84xf32>
    %34 = arith.addf %25, %30 : vector<28x84xf32>
    %35 = arith.addf %26, %33 : vector<28x84xf32>
    %36 = vector.extract_strided_slice %1 {offsets = [4, 0], sizes = [28, 32], strides = [1, 1]} : vector<96x32xbf16> to vector<28x32xbf16>
    %c4 = arith.constant 4 : index
    %c0_30 = arith.constant 0 : index
    %c0_31 = arith.constant 0 : index
    %37 = vector.load %arg2[%c4, %c0_30, %c0_31] : memref<15x32x84xbf16, #tpu.memory_space<vmem>>, vector<1x32x84xbf16>
    %38 = vector.shape_cast %37 : vector<1x32x84xbf16> to vector<32x84xbf16>
    %cst_32 = arith.constant dense<0.000000e+00> : vector<28x84xf32>
    %39 = tpu.matmul %36, %38, %cst_32 {dimension_numbers = #tpu.dot_dimension_numbers<[1], [0], [0], [1], [0, 0, 1, 1], [], []>} : vector<28x32xbf16>, vector<32x84xbf16>, vector<28x84xf32> -> vector<28x84xf32>
    %c4_33 = arith.constant 4 : index
    %c0_34 = arith.constant 0 : index
    %c0_35 = arith.constant 0 : index
    %40 = vector.load %arg3[%c4_33, %c0_34, %c0_35] : memref<15x32x84xbf16, #tpu.memory_space<vmem>>, vector<1x32x84xbf16>
    %41 = vector.shape_cast %40 : vector<1x32x84xbf16> to vector<32x84xbf16>
    %cst_36 = arith.constant dense<0.000000e+00> : vector<28x84xf32>
    %42 = tpu.matmul %36, %41, %cst_36 {dimension_numbers = #tpu.dot_dimension_numbers<[1], [0], [0], [1], [0, 0, 1, 1], [], []>} : vector<28x32xbf16>, vector<32x84xbf16>, vector<28x84xf32> -> vector<28x84xf32>
    %43 = arith.addf %34, %39 : vector<28x84xf32>
    %44 = arith.addf %35, %42 : vector<28x84xf32>
    %45 = vector.extract_strided_slice %1 {offsets = [32, 0], sizes = [28, 32], strides = [1, 1]} : vector<96x32xbf16> to vector<28x32xbf16>
    %c5 = arith.constant 5 : index
    %c0_37 = arith.constant 0 : index
    %c0_38 = arith.constant 0 : index
    %46 = vector.load %arg2[%c5, %c0_37, %c0_38] : memref<15x32x84xbf16, #tpu.memory_space<vmem>>, vector<1x32x84xbf16>
    %47 = vector.shape_cast %46 : vector<1x32x84xbf16> to vector<32x84xbf16>
    %cst_39 = arith.constant dense<0.000000e+00> : vector<28x84xf32>
    %48 = tpu.matmul %45, %47, %cst_39 {dimension_numbers = #tpu.dot_dimension_numbers<[1], [0], [0], [1], [0, 0, 1, 1], [], []>} : vector<28x32xbf16>, vector<32x84xbf16>, vector<28x84xf32> -> vector<28x84xf32>
    %c5_40 = arith.constant 5 : index
    %c0_41 = arith.constant 0 : index
    %c0_42 = arith.constant 0 : index
    %49 = vector.load %arg3[%c5_40, %c0_41, %c0_42] : memref<15x32x84xbf16, #tpu.memory_space<vmem>>, vector<1x32x84xbf16>
    %50 = vector.shape_cast %49 : vector<1x32x84xbf16> to vector<32x84xbf16>
    %cst_43 = arith.constant dense<0.000000e+00> : vector<28x84xf32>
    %51 = tpu.matmul %45, %50, %cst_43 {dimension_numbers = #tpu.dot_dimension_numbers<[1], [0], [0], [1], [0, 0, 1, 1], [], []>} : vector<28x32xbf16>, vector<32x84xbf16>, vector<28x84xf32> -> vector<28x84xf32>
    %52 = arith.addf %43, %48 : vector<28x84xf32>
    %53 = arith.addf %44, %51 : vector<28x84xf32>
    %54 = vector.extract_strided_slice %1 {offsets = [33, 0], sizes = [28, 32], strides = [1, 1]} : vector<96x32xbf16> to vector<28x32xbf16>
    %c6 = arith.constant 6 : index
    %c0_44 = arith.constant 0 : index
    %c0_45 = arith.constant 0 : index
    %55 = vector.load %arg2[%c6, %c0_44, %c0_45] : memref<15x32x84xbf16, #tpu.memory_space<vmem>>, vector<1x32x84xbf16>
    %56 = vector.shape_cast %55 : vector<1x32x84xbf16> to vector<32x84xbf16>
    %cst_46 = arith.constant dense<0.000000e+00> : vector<28x84xf32>
    %57 = tpu.matmul %54, %56, %cst_46 {dimension_numbers = #tpu.dot_dimension_numbers<[1], [0], [0], [1], [0, 0, 1, 1], [], []>} : vector<28x32xbf16>, vector<32x84xbf16>, vector<28x84xf32> -> vector<28x84xf32>
    %c6_47 = arith.constant 6 : index
    %c0_48 = arith.constant 0 : index
    %c0_49 = arith.constant 0 : index
    %58 = vector.load %arg3[%c6_47, %c0_48, %c0_49] : memref<15x32x84xbf16, #tpu.memory_space<vmem>>, vector<1x32x84xbf16>
    %59 = vector.shape_cast %58 : vector<1x32x84xbf16> to vector<32x84xbf16>
    %cst_50 = arith.constant dense<0.000000e+00> : vector<28x84xf32>
    %60 = tpu.matmul %54, %59, %cst_50 {dimension_numbers = #tpu.dot_dimension_numbers<[1], [0], [0], [1], [0, 0, 1, 1], [], []>} : vector<28x32xbf16>, vector<32x84xbf16>, vector<28x84xf32> -> vector<28x84xf32>
    %61 = arith.addf %52, %57 : vector<28x84xf32>
    %62 = arith.addf %53, %60 : vector<28x84xf32>
    %63 = vector.extract_strided_slice %1 {offsets = [34, 0], sizes = [28, 32], strides = [1, 1]} : vector<96x32xbf16> to vector<28x32xbf16>
    %c7 = arith.constant 7 : index
    %c0_51 = arith.constant 0 : index
    %c0_52 = arith.constant 0 : index
    %64 = vector.load %arg2[%c7, %c0_51, %c0_52] : memref<15x32x84xbf16, #tpu.memory_space<vmem>>, vector<1x32x84xbf16>
    %65 = vector.shape_cast %64 : vector<1x32x84xbf16> to vector<32x84xbf16>
    %cst_53 = arith.constant dense<0.000000e+00> : vector<28x84xf32>
    %66 = tpu.matmul %63, %65, %cst_53 {dimension_numbers = #tpu.dot_dimension_numbers<[1], [0], [0], [1], [0, 0, 1, 1], [], []>} : vector<28x32xbf16>, vector<32x84xbf16>, vector<28x84xf32> -> vector<28x84xf32>
    %c7_54 = arith.constant 7 : index
    %c0_55 = arith.constant 0 : index
    %c0_56 = arith.constant 0 : index
    %67 = vector.load %arg3[%c7_54, %c0_55, %c0_56] : memref<15x32x84xbf16, #tpu.memory_space<vmem>>, vector<1x32x84xbf16>
    %68 = vector.shape_cast %67 : vector<1x32x84xbf16> to vector<32x84xbf16>
    %cst_57 = arith.constant dense<0.000000e+00> : vector<28x84xf32>
    %69 = tpu.matmul %63, %68, %cst_57 {dimension_numbers = #tpu.dot_dimension_numbers<[1], [0], [0], [1], [0, 0, 1, 1], [], []>} : vector<28x32xbf16>, vector<32x84xbf16>, vector<28x84xf32> -> vector<28x84xf32>
    %70 = arith.addf %61, %66 : vector<28x84xf32>
    %71 = arith.addf %62, %69 : vector<28x84xf32>
    %72 = vector.extract_strided_slice %1 {offsets = [35, 0], sizes = [28, 32], strides = [1, 1]} : vector<96x32xbf16> to vector<28x32xbf16>
    %c8 = arith.constant 8 : index
    %c0_58 = arith.constant 0 : index
    %c0_59 = arith.constant 0 : index
    %73 = vector.load %arg2[%c8, %c0_58, %c0_59] : memref<15x32x84xbf16, #tpu.memory_space<vmem>>, vector<1x32x84xbf16>
    %74 = vector.shape_cast %73 : vector<1x32x84xbf16> to vector<32x84xbf16>
    %cst_60 = arith.constant dense<0.000000e+00> : vector<28x84xf32>
    %75 = tpu.matmul %72, %74, %cst_60 {dimension_numbers = #tpu.dot_dimension_numbers<[1], [0], [0], [1], [0, 0, 1, 1], [], []>} : vector<28x32xbf16>, vector<32x84xbf16>, vector<28x84xf32> -> vector<28x84xf32>
    %c8_61 = arith.constant 8 : index
    %c0_62 = arith.constant 0 : index
    %c0_63 = arith.constant 0 : index
    %76 = vector.load %arg3[%c8_61, %c0_62, %c0_63] : memref<15x32x84xbf16, #tpu.memory_space<vmem>>, vector<1x32x84xbf16>
    %77 = vector.shape_cast %76 : vector<1x32x84xbf16> to vector<32x84xbf16>
    %cst_64 = arith.constant dense<0.000000e+00> : vector<28x84xf32>
    %78 = tpu.matmul %72, %77, %cst_64 {dimension_numbers = #tpu.dot_dimension_numbers<[1], [0], [0], [1], [0, 0, 1, 1], [], []>} : vector<28x32xbf16>, vector<32x84xbf16>, vector<28x84xf32> -> vector<28x84xf32>
    %79 = arith.addf %70, %75 : vector<28x84xf32>
    %80 = arith.addf %71, %78 : vector<28x84xf32>
    %81 = vector.extract_strided_slice %1 {offsets = [36, 0], sizes = [28, 32], strides = [1, 1]} : vector<96x32xbf16> to vector<28x32xbf16>
    %c9 = arith.constant 9 : index
    %c0_65 = arith.constant 0 : index
    %c0_66 = arith.constant 0 : index
    %82 = vector.load %arg2[%c9, %c0_65, %c0_66] : memref<15x32x84xbf16, #tpu.memory_space<vmem>>, vector<1x32x84xbf16>
    %83 = vector.shape_cast %82 : vector<1x32x84xbf16> to vector<32x84xbf16>
    %cst_67 = arith.constant dense<0.000000e+00> : vector<28x84xf32>
    %84 = tpu.matmul %81, %83, %cst_67 {dimension_numbers = #tpu.dot_dimension_numbers<[1], [0], [0], [1], [0, 0, 1, 1], [], []>} : vector<28x32xbf16>, vector<32x84xbf16>, vector<28x84xf32> -> vector<28x84xf32>
    %c9_68 = arith.constant 9 : index
    %c0_69 = arith.constant 0 : index
    %c0_70 = arith.constant 0 : index
    %85 = vector.load %arg3[%c9_68, %c0_69, %c0_70] : memref<15x32x84xbf16, #tpu.memory_space<vmem>>, vector<1x32x84xbf16>
    %86 = vector.shape_cast %85 : vector<1x32x84xbf16> to vector<32x84xbf16>
    %cst_71 = arith.constant dense<0.000000e+00> : vector<28x84xf32>
    %87 = tpu.matmul %81, %86, %cst_71 {dimension_numbers = #tpu.dot_dimension_numbers<[1], [0], [0], [1], [0, 0, 1, 1], [], []>} : vector<28x32xbf16>, vector<32x84xbf16>, vector<28x84xf32> -> vector<28x84xf32>
    %88 = arith.addf %79, %84 : vector<28x84xf32>
    %89 = arith.addf %80, %87 : vector<28x84xf32>
    %90 = vector.extract_strided_slice %1 {offsets = [64, 0], sizes = [28, 32], strides = [1, 1]} : vector<96x32xbf16> to vector<28x32xbf16>
    %c10 = arith.constant 10 : index
    %c0_72 = arith.constant 0 : index
    %c0_73 = arith.constant 0 : index
    %91 = vector.load %arg2[%c10, %c0_72, %c0_73] : memref<15x32x84xbf16, #tpu.memory_space<vmem>>, vector<1x32x84xbf16>
    %92 = vector.shape_cast %91 : vector<1x32x84xbf16> to vector<32x84xbf16>
    %cst_74 = arith.constant dense<0.000000e+00> : vector<28x84xf32>
    %93 = tpu.matmul %90, %92, %cst_74 {dimension_numbers = #tpu.dot_dimension_numbers<[1], [0], [0], [1], [0, 0, 1, 1], [], []>} : vector<28x32xbf16>, vector<32x84xbf16>, vector<28x84xf32> -> vector<28x84xf32>
    %c10_75 = arith.constant 10 : index
    %c0_76 = arith.constant 0 : index
    %c0_77 = arith.constant 0 : index
    %94 = vector.load %arg3[%c10_75, %c0_76, %c0_77] : memref<15x32x84xbf16, #tpu.memory_space<vmem>>, vector<1x32x84xbf16>
    %95 = vector.shape_cast %94 : vector<1x32x84xbf16> to vector<32x84xbf16>
    %cst_78 = arith.constant dense<0.000000e+00> : vector<28x84xf32>
    %96 = tpu.matmul %90, %95, %cst_78 {dimension_numbers = #tpu.dot_dimension_numbers<[1], [0], [0], [1], [0, 0, 1, 1], [], []>} : vector<28x32xbf16>, vector<32x84xbf16>, vector<28x84xf32> -> vector<28x84xf32>
    %97 = arith.addf %88, %93 : vector<28x84xf32>
    %98 = arith.addf %89, %96 : vector<28x84xf32>
    %99 = vector.extract_strided_slice %1 {offsets = [65, 0], sizes = [28, 32], strides = [1, 1]} : vector<96x32xbf16> to vector<28x32xbf16>
    %c11 = arith.constant 11 : index
    %c0_79 = arith.constant 0 : index
    %c0_80 = arith.constant 0 : index
    %100 = vector.load %arg2[%c11, %c0_79, %c0_80] : memref<15x32x84xbf16, #tpu.memory_space<vmem>>, vector<1x32x84xbf16>
    %101 = vector.shape_cast %100 : vector<1x32x84xbf16> to vector<32x84xbf16>
    %cst_81 = arith.constant dense<0.000000e+00> : vector<28x84xf32>
    %102 = tpu.matmul %99, %101, %cst_81 {dimension_numbers = #tpu.dot_dimension_numbers<[1], [0], [0], [1], [0, 0, 1, 1], [], []>} : vector<28x32xbf16>, vector<32x84xbf16>, vector<28x84xf32> -> vector<28x84xf32>
    %c11_82 = arith.constant 11 : index
    %c0_83 = arith.constant 0 : index
    %c0_84 = arith.constant 0 : index
    %103 = vector.load %arg3[%c11_82, %c0_83, %c0_84] : memref<15x32x84xbf16, #tpu.memory_space<vmem>>, vector<1x32x84xbf16>
    %104 = vector.shape_cast %103 : vector<1x32x84xbf16> to vector<32x84xbf16>
    %cst_85 = arith.constant dense<0.000000e+00> : vector<28x84xf32>
    %105 = tpu.matmul %99, %104, %cst_85 {dimension_numbers = #tpu.dot_dimension_numbers<[1], [0], [0], [1], [0, 0, 1, 1], [], []>} : vector<28x32xbf16>, vector<32x84xbf16>, vector<28x84xf32> -> vector<28x84xf32>
    %106 = arith.addf %97, %102 : vector<28x84xf32>
    %107 = arith.addf %98, %105 : vector<28x84xf32>
    %108 = vector.extract_strided_slice %1 {offsets = [66, 0], sizes = [28, 32], strides = [1, 1]} : vector<96x32xbf16> to vector<28x32xbf16>
    %c12 = arith.constant 12 : index
    %c0_86 = arith.constant 0 : index
    %c0_87 = arith.constant 0 : index
    %109 = vector.load %arg2[%c12, %c0_86, %c0_87] : memref<15x32x84xbf16, #tpu.memory_space<vmem>>, vector<1x32x84xbf16>
    %110 = vector.shape_cast %109 : vector<1x32x84xbf16> to vector<32x84xbf16>
    %cst_88 = arith.constant dense<0.000000e+00> : vector<28x84xf32>
    %111 = tpu.matmul %108, %110, %cst_88 {dimension_numbers = #tpu.dot_dimension_numbers<[1], [0], [0], [1], [0, 0, 1, 1], [], []>} : vector<28x32xbf16>, vector<32x84xbf16>, vector<28x84xf32> -> vector<28x84xf32>
    %c12_89 = arith.constant 12 : index
    %c0_90 = arith.constant 0 : index
    %c0_91 = arith.constant 0 : index
    %112 = vector.load %arg3[%c12_89, %c0_90, %c0_91] : memref<15x32x84xbf16, #tpu.memory_space<vmem>>, vector<1x32x84xbf16>
    %113 = vector.shape_cast %112 : vector<1x32x84xbf16> to vector<32x84xbf16>
    %cst_92 = arith.constant dense<0.000000e+00> : vector<28x84xf32>
    %114 = tpu.matmul %108, %113, %cst_92 {dimension_numbers = #tpu.dot_dimension_numbers<[1], [0], [0], [1], [0, 0, 1, 1], [], []>} : vector<28x32xbf16>, vector<32x84xbf16>, vector<28x84xf32> -> vector<28x84xf32>
    %115 = arith.addf %106, %111 : vector<28x84xf32>
    %116 = arith.addf %107, %114 : vector<28x84xf32>
    %117 = vector.extract_strided_slice %1 {offsets = [67, 0], sizes = [28, 32], strides = [1, 1]} : vector<96x32xbf16> to vector<28x32xbf16>
    %c13 = arith.constant 13 : index
    %c0_93 = arith.constant 0 : index
    %c0_94 = arith.constant 0 : index
    %118 = vector.load %arg2[%c13, %c0_93, %c0_94] : memref<15x32x84xbf16, #tpu.memory_space<vmem>>, vector<1x32x84xbf16>
    %119 = vector.shape_cast %118 : vector<1x32x84xbf16> to vector<32x84xbf16>
    %cst_95 = arith.constant dense<0.000000e+00> : vector<28x84xf32>
    %120 = tpu.matmul %117, %119, %cst_95 {dimension_numbers = #tpu.dot_dimension_numbers<[1], [0], [0], [1], [0, 0, 1, 1], [], []>} : vector<28x32xbf16>, vector<32x84xbf16>, vector<28x84xf32> -> vector<28x84xf32>
    %c13_96 = arith.constant 13 : index
    %c0_97 = arith.constant 0 : index
    %c0_98 = arith.constant 0 : index
    %121 = vector.load %arg3[%c13_96, %c0_97, %c0_98] : memref<15x32x84xbf16, #tpu.memory_space<vmem>>, vector<1x32x84xbf16>
    %122 = vector.shape_cast %121 : vector<1x32x84xbf16> to vector<32x84xbf16>
    %cst_99 = arith.constant dense<0.000000e+00> : vector<28x84xf32>
    %123 = tpu.matmul %117, %122, %cst_99 {dimension_numbers = #tpu.dot_dimension_numbers<[1], [0], [0], [1], [0, 0, 1, 1], [], []>} : vector<28x32xbf16>, vector<32x84xbf16>, vector<28x84xf32> -> vector<28x84xf32>
    %124 = arith.addf %115, %120 : vector<28x84xf32>
    %125 = arith.addf %116, %123 : vector<28x84xf32>
    %126 = vector.extract_strided_slice %1 {offsets = [68, 0], sizes = [28, 32], strides = [1, 1]} : vector<96x32xbf16> to vector<28x32xbf16>
    %c14 = arith.constant 14 : index
    %c0_100 = arith.constant 0 : index
    %c0_101 = arith.constant 0 : index
    %127 = vector.load %arg2[%c14, %c0_100, %c0_101] : memref<15x32x84xbf16, #tpu.memory_space<vmem>>, vector<1x32x84xbf16>
    %128 = vector.shape_cast %127 : vector<1x32x84xbf16> to vector<32x84xbf16>
    %cst_102 = arith.constant dense<0.000000e+00> : vector<28x84xf32>
    %129 = tpu.matmul %126, %128, %cst_102 {dimension_numbers = #tpu.dot_dimension_numbers<[1], [0], [0], [1], [0, 0, 1, 1], [], []>} : vector<28x32xbf16>, vector<32x84xbf16>, vector<28x84xf32> -> vector<28x84xf32>
    %c14_103 = arith.constant 14 : index
    %c0_104 = arith.constant 0 : index
    %c0_105 = arith.constant 0 : index
    %130 = vector.load %arg3[%c14_103, %c0_104, %c0_105] : memref<15x32x84xbf16, #tpu.memory_space<vmem>>, vector<1x32x84xbf16>
    %131 = vector.shape_cast %130 : vector<1x32x84xbf16> to vector<32x84xbf16>
    %cst_106 = arith.constant dense<0.000000e+00> : vector<28x84xf32>
    %132 = tpu.matmul %126, %131, %cst_106 {dimension_numbers = #tpu.dot_dimension_numbers<[1], [0], [0], [1], [0, 0, 1, 1], [], []>} : vector<28x32xbf16>, vector<32x84xbf16>, vector<28x84xf32> -> vector<28x84xf32>
    %133 = arith.addf %124, %129 : vector<28x84xf32>
    %134 = arith.addf %125, %132 : vector<28x84xf32>
    %135 = arith.maximumf %133, %134 : vector<28x84xf32>
    %c0_107 = arith.constant 0 : index
    %c0_108 = arith.constant 0 : index
    %136 = vector.load %arg4[%c0_107, %c0_108] : memref<14x28xf32, #tpu.memory_space<vmem>>, vector<14x28xf32>
    %cst_109 = arith.constant dense<0.000000e+00> : vector<14x84xf32>
    %137 = tpu.matmul %136, %135, %cst_109 {dimension_numbers = #tpu.dot_dimension_numbers<[1], [0], [0], [1], [0, 0, 1, 1], [], []>} : vector<14x28xf32>, vector<28x84xf32>, vector<14x84xf32> -> vector<14x84xf32>
    %c0_110 = arith.constant 0 : index
    %c0_111 = arith.constant 0 : index
    %138 = vector.load %arg5[%c0_110, %c0_111] : memref<14x28xf32, #tpu.memory_space<vmem>>, vector<14x28xf32>
    %cst_112 = arith.constant dense<0.000000e+00> : vector<14x84xf32>
    %139 = tpu.matmul %138, %135, %cst_112 {dimension_numbers = #tpu.dot_dimension_numbers<[1], [0], [0], [1], [0, 0, 1, 1], [], []>} : vector<14x28xf32>, vector<28x84xf32>, vector<14x84xf32> -> vector<14x84xf32>
    %140 = arith.maximumf %137, %139 : vector<14x84xf32>
    %c0_113 = arith.constant 0 : index
    %c0_114 = arith.constant 0 : index
    %141 = vector.load %arg6[%c0_113, %c0_114] : memref<1x84xf32, #tpu.memory_space<vmem>>, vector<1x84xf32>
    %142 = vector.broadcast %141 : vector<1x84xf32> to vector<14x84xf32>
    %143 = arith.addf %140, %142 : vector<14x84xf32>
    %cst_115 = arith.constant 0.000000e+00 : f32
    %144 = vector.broadcast %cst_115 : f32 to vector<14x84xf32>
    %145 = arith.maximumf %143, %144 : vector<14x84xf32>
    %146 = arith.truncf %145 : vector<14x84xf32> to vector<14x84xbf16>
    %c0_116 = arith.constant 0 : index
    %c0_117 = arith.constant 0 : index
    %c0_118 = arith.constant 0 : index
    %147 = vector.load %arg7[%c0_116, %c0_117, %c0_118] : memref<1x14x84xbf16, #tpu.memory_space<vmem>>, vector<1x14x84xbf16>
    %148 = vector.shape_cast %147 : vector<1x14x84xbf16> to vector<14x84xbf16>
    %149 = vector.shape_cast %146 : vector<14x84xbf16> to vector<1x14x84xbf16>
    tpu.vector_store %arg7[%c0_116, %c0_117, %c0_118], %149 {strides = array<i32>} : memref<1x14x84xbf16, #tpu.memory_space<vmem>>, vector<1x14x84xbf16>,
    return
  }
  func.func @transform_0(%arg0: i32) -> (i32, i32, i32) {
    %c0_i32 = arith.constant 0 : i32
    %c0_i32_0 = arith.constant 0 : i32
    %c0_i32_1 = arith.constant 0 : i32
    return %arg0, %c0_i32, %c0_i32_0 : i32, i32, i32
  }
  func.func @transform_1(%arg0: i32) -> (i32, i32, i32) {
    %c0_i32 = arith.constant 0 : i32
    %c0_i32_0 = arith.constant 0 : i32
    %c0_i32_1 = arith.constant 0 : i32
    %c0_i32_2 = arith.constant 0 : i32
    return %c0_i32, %c0_i32_0, %c0_i32_1 : i32, i32, i32
  }
  func.func @transform_2(%arg0: i32) -> (i32, i32, i32) {
    %c0_i32 = arith.constant 0 : i32
    %c0_i32_0 = arith.constant 0 : i32
    %c0_i32_1 = arith.constant 0 : i32
    %c0_i32_2 = arith.constant 0 : i32
    return %c0_i32, %c0_i32_0, %c0_i32_1 : i32, i32, i32
  }
  func.func @transform_3(%arg0: i32) -> (i32, i32) {
    %c0_i32 = arith.constant 0 : i32
    %c0_i32_0 = arith.constant 0 : i32
    %c0_i32_1 = arith.constant 0 : i32
    return %c0_i32, %c0_i32_0 : i32, i32
  }
  func.func @transform_4(%arg0: i32) -> (i32, i32) {
    %c0_i32 = arith.constant 0 : i32
    %c0_i32_0 = arith.constant 0 : i32
    %c0_i32_1 = arith.constant 0 : i32
    return %c0_i32, %c0_i32_0 : i32, i32
  }
  func.func @transform_5(%arg0: i32) -> (i32, i32) {
    %c0_i32 = arith.constant 0 : i32
    %c0_i32_0 = arith.constant 0 : i32
    %c0_i32_1 = arith.constant 0 : i32
    return %c0_i32, %c0_i32_0 : i32, i32
  }
  func.func @transform_6(%arg0: i32) -> (i32, i32, i32) {
    %c0_i32 = arith.constant 0 : i32
    %c0_i32_0 = arith.constant 0 : i32
    %c0_i32_1 = arith.constant 0 : i32
    return %arg0, %c0_i32, %c0_i32_0 : i32, i32, i32
  }
}

module attributes {stable_mosaic.version = 11 : i64} {
  func.func @_fc_kernel(%arg0: i32, %arg1: memref<2x400xbf16, #tpu.memory_space<vmem>>, %arg2: memref<400x120xbf16, #tpu.memory_space<vmem>>, %arg3: memref<1x120xf32, #tpu.memory_space<vmem>>, %arg4: memref<120x84xbf16, #tpu.memory_space<vmem>>, %arg5: memref<1x84xf32, #tpu.memory_space<vmem>>, %arg6: memref<84x10xbf16, #tpu.memory_space<vmem>>, %arg7: memref<1x10xf32, #tpu.memory_space<vmem>>, %arg8: memref<2x10xf32, #tpu.memory_space<vmem>>) attributes {dimension_semantics = [#tpu.dimension_semantics<parallel>], iteration_bounds = array<i64: 1>, scalar_prefetch = 0 : i64, scratch_operands = 0 : i64, tpu.core_type = #tpu.core_type<tc>, window_params = [{transform_indices = @transform_0, window_bounds = array<i64: 2, 400>}, {pipeline_mode = #tpu.pipeline_mode<synchronous>, transform_indices = @transform_1, window_bounds = array<i64: 400, 120>}, {pipeline_mode = #tpu.pipeline_mode<synchronous>, transform_indices = @transform_2, window_bounds = array<i64: 1, 120>}, {pipeline_mode = #tpu.pipeline_mode<synchronous>, transform_indices = @transform_3, window_bounds = array<i64: 120, 84>}, {pipeline_mode = #tpu.pipeline_mode<synchronous>, transform_indices = @transform_4, window_bounds = array<i64: 1, 84>}, {pipeline_mode = #tpu.pipeline_mode<synchronous>, transform_indices = @transform_5, window_bounds = array<i64: 84, 10>}, {pipeline_mode = #tpu.pipeline_mode<synchronous>, transform_indices = @transform_6, window_bounds = array<i64: 1, 10>}, {transform_indices = @transform_7, window_bounds = array<i64: 2, 10>}]} {
    %c0 = arith.constant 0 : index
    %c0_0 = arith.constant 0 : index
    %0 = vector.load %arg1[%c0, %c0_0] : memref<2x400xbf16, #tpu.memory_space<vmem>>, vector<2x400xbf16>
    %c0_1 = arith.constant 0 : index
    %c0_2 = arith.constant 0 : index
    %1 = vector.load %arg2[%c0_1, %c0_2] : memref<400x120xbf16, #tpu.memory_space<vmem>>, vector<400x120xbf16>
    %cst = arith.constant dense<0.000000e+00> : vector<2x120xf32>
    %2 = tpu.matmul %0, %1, %cst {dimension_numbers = #tpu.dot_dimension_numbers<[1], [0], [0], [1], [0, 0, 1, 1], [], []>} : vector<2x400xbf16>, vector<400x120xbf16>, vector<2x120xf32> -> vector<2x120xf32>
    %c0_3 = arith.constant 0 : index
    %c0_4 = arith.constant 0 : index
    %3 = vector.load %arg3[%c0_3, %c0_4] : memref<1x120xf32, #tpu.memory_space<vmem>>, vector<1x120xf32>
    %4 = vector.broadcast %3 : vector<1x120xf32> to vector<2x120xf32>
    %5 = arith.addf %2, %4 : vector<2x120xf32>
    %cst_5 = arith.constant 0.000000e+00 : f32
    %6 = vector.broadcast %cst_5 : f32 to vector<2x120xf32>
    %7 = arith.maximumf %5, %6 : vector<2x120xf32>
    %8 = arith.truncf %7 : vector<2x120xf32> to vector<2x120xbf16>
    %c0_6 = arith.constant 0 : index
    %c0_7 = arith.constant 0 : index
    %9 = vector.load %arg4[%c0_6, %c0_7] : memref<120x84xbf16, #tpu.memory_space<vmem>>, vector<120x84xbf16>
    %cst_8 = arith.constant dense<0.000000e+00> : vector<2x84xf32>
    %10 = tpu.matmul %8, %9, %cst_8 {dimension_numbers = #tpu.dot_dimension_numbers<[1], [0], [0], [1], [0, 0, 1, 1], [], []>} : vector<2x120xbf16>, vector<120x84xbf16>, vector<2x84xf32> -> vector<2x84xf32>
    %c0_9 = arith.constant 0 : index
    %c0_10 = arith.constant 0 : index
    %11 = vector.load %arg5[%c0_9, %c0_10] : memref<1x84xf32, #tpu.memory_space<vmem>>, vector<1x84xf32>
    %12 = vector.broadcast %11 : vector<1x84xf32> to vector<2x84xf32>
    %13 = arith.addf %10, %12 : vector<2x84xf32>
    %cst_11 = arith.constant 0.000000e+00 : f32
    %14 = vector.broadcast %cst_11 : f32 to vector<2x84xf32>
    %15 = arith.maximumf %13, %14 : vector<2x84xf32>
    %16 = arith.truncf %15 : vector<2x84xf32> to vector<2x84xbf16>
    %c0_12 = arith.constant 0 : index
    %c0_13 = arith.constant 0 : index
    %17 = vector.load %arg6[%c0_12, %c0_13] : memref<84x10xbf16, #tpu.memory_space<vmem>>, vector<84x10xbf16>
    %cst_14 = arith.constant dense<0.000000e+00> : vector<2x10xf32>
    %18 = tpu.matmul %16, %17, %cst_14 {dimension_numbers = #tpu.dot_dimension_numbers<[1], [0], [0], [1], [0, 0, 1, 1], [], []>} : vector<2x84xbf16>, vector<84x10xbf16>, vector<2x10xf32> -> vector<2x10xf32>
    %c0_15 = arith.constant 0 : index
    %c0_16 = arith.constant 0 : index
    %19 = vector.load %arg7[%c0_15, %c0_16] : memref<1x10xf32, #tpu.memory_space<vmem>>, vector<1x10xf32>
    %20 = vector.broadcast %19 : vector<1x10xf32> to vector<2x10xf32>
    %21 = arith.addf %18, %20 : vector<2x10xf32>
    %c0_17 = arith.constant 0 : index
    %c0_18 = arith.constant 0 : index
    %22 = vector.load %arg8[%c0_17, %c0_18] : memref<2x10xf32, #tpu.memory_space<vmem>>, vector<2x10xf32>
    tpu.vector_store %arg8[%c0_17, %c0_18], %21 {strides = array<i32>} : memref<2x10xf32, #tpu.memory_space<vmem>>, vector<2x10xf32>,
    return
  }
  func.func @transform_0(%arg0: i32) -> (i32, i32) {
    %c0_i32 = arith.constant 0 : i32
    %c0_i32_0 = arith.constant 0 : i32
    return %arg0, %c0_i32 : i32, i32
  }
  func.func @transform_1(%arg0: i32) -> (i32, i32) {
    %c0_i32 = arith.constant 0 : i32
    %c0_i32_0 = arith.constant 0 : i32
    %c0_i32_1 = arith.constant 0 : i32
    return %c0_i32, %c0_i32_0 : i32, i32
  }
  func.func @transform_2(%arg0: i32) -> (i32, i32) {
    %c0_i32 = arith.constant 0 : i32
    %c0_i32_0 = arith.constant 0 : i32
    %c0_i32_1 = arith.constant 0 : i32
    return %c0_i32, %c0_i32_0 : i32, i32
  }
  func.func @transform_3(%arg0: i32) -> (i32, i32) {
    %c0_i32 = arith.constant 0 : i32
    %c0_i32_0 = arith.constant 0 : i32
    %c0_i32_1 = arith.constant 0 : i32
    return %c0_i32, %c0_i32_0 : i32, i32
  }
  func.func @transform_4(%arg0: i32) -> (i32, i32) {
    %c0_i32 = arith.constant 0 : i32
    %c0_i32_0 = arith.constant 0 : i32
    %c0_i32_1 = arith.constant 0 : i32
    return %c0_i32, %c0_i32_0 : i32, i32
  }
  func.func @transform_5(%arg0: i32) -> (i32, i32) {
    %c0_i32 = arith.constant 0 : i32
    %c0_i32_0 = arith.constant 0 : i32
    %c0_i32_1 = arith.constant 0 : i32
    return %c0_i32, %c0_i32_0 : i32, i32
  }
  func.func @transform_6(%arg0: i32) -> (i32, i32) {
    %c0_i32 = arith.constant 0 : i32
    %c0_i32_0 = arith.constant 0 : i32
    %c0_i32_1 = arith.constant 0 : i32
    return %c0_i32, %c0_i32_0 : i32, i32
  }
  func.func @transform_7(%arg0: i32) -> (i32, i32) {
    %c0_i32 = arith.constant 0 : i32
    %c0_i32_0 = arith.constant 0 : i32
    return %arg0, %c0_i32 : i32, i32
  }
}

</mosaic_0001>

<bundles_post_ra>
// kernel: convnet_forward.4
= control target key start
LH: loop header
LB: loop body
LE: loop exit
PB: predicated region body
PF: predicated region fallthrough
CT: control target
= control target key end

     0   :  { %s1951_s21 = smov 0   ;;  %s2283_s0 = inlined_call_operand.vmem [shape: bf16[2,14,84], index: 0, kind: input, shape index: {}]   ;;  %s2284_s1 = inlined_call_operand.vmem [shape: bf16[5,84,80], index: 1, kind: input, shape index: {}]   ;;  %s2285_s2 = inlined_call_operand.vmem [shape: bf16[5,84,80], index: 2, kind: input, shape index: {}]   ;;  %s2286_s3 = inlined_call_operand.vmem [shape: f32[5,10], index: 3, kind: input, shape index: {}]   ;;  %s2287_s4 = inlined_call_operand.vmem [shape: f32[5,10], index: 4, kind: input, shape index: {}]   ;;  %s2288_s5 = inlined_call_operand.vmem [shape: f32[1,80], index: 5, kind: input, shape index: {}]   ;;  %s2289_s6 = inlined_call_operand.vmem [shape: bf16[2,5,80], index: 6, kind: output, shape index: {}]  }
   0x1 LB: > { %s1410_s22 = sadd.s32 4294967295, %s1912_s21   ;;  %p1414_p0 = scmp.ge.s32.totalorder %s1912_s21, 1  ;;  %s1912_s21 = sphi %s1951_s21, %s16_s21  }
   0x2   : > { %p212_p1 = scmp.lt.s32.totalorder %s1912_s21, 3 }
   0x4   : > { %p213_p2 = pnand %p1414_p0, %p212_p1 }
   0x5   : > { %p241_p3 = scmp.lt.s32.totalorder (!%p213_p2), %s1410_s22, 1 }
   0x6   : > { %216 = sbr.rel (%p213_p2) target bundleno = 540 (0x21c), region = 44 }
   0xb   : > { %v1845_v0 = vld [vmem:[%s2284_s1 + $0x54] ss:$0 sps:$4 sm:$0x33]   ;;  %v1914_v1 = vmov 0.0   ;;  %vm336_vm0 = vcmask 1041408   ;;  %v1847_v5 = vld [vmem:[%s2284_s1 + $0x4c] sm:$0xff]  }
   0xc   : > { %1661 = vmatprep.subr.bf16.mxu0 %v1914_v1  ;;  %1677 = vmatprep.subr.bf16.mxu1 %v1914_v1  ;;  %v1846_v2 = vld [vmem:[%s2285_s2 + $0x54] ss:$0 sps:$4 sm:$0x33]   ;;  %v338_v3 = vsel %vm336_vm0, %v1845_v0, 0  ;;  %v1848_v6 = vld [vmem:[%s2285_s2 + $0x4c] sm:$0xff]   ;;  %vm1915_vm1 = vmmov 0  }
   0xd   : > { %1662 = vmatpush3.bf16.msra.mxu0 %v338_v3  ;;  %v427_v4 = vsel %vm336_vm0, %v1846_v2, 0  ;;  %1673 = vmatprep.mubr.msk.bf16.mxu0 %vm1915_vm1, %v1914_v1  ;;  %v1849_v7 = vld [vmem:[%s2284_s1 + $0x44] sm:$0xff]   ;;  %s2291_s22 = smov (!%p241_p3, %s1410_s22), 1  ;;  %v1851_v9 = vld [vmem:[%s2284_s1 + $0x3c] sm:$0xff]   ;;  %v1853_v14 = vld [vmem:[%s2284_s1 + $0x34] sm:$0xff]   ;;  %vm332_vm2 = vcmask 687104  }
   0xe   : > { %1678 = vmatpush3.bf16.msra.mxu1 %v427_v4  ;;  %1663 = vmatprep.subr.bf16.mxu0 %v1914_v1  ;;  %v1850_v8 = vld [vmem:[%s2285_s2 + $0x44] sm:$0xff]   ;;  %s1584_s11 = sshll.u32 %s2291_s22, 3  ;;  %v1852_v10 = vld [vmem:[%s2285_s2 + $0x3c] sm:$0xff]   ;;  %v1854_v15 = vld [vmem:[%s2285_s2 + $0x34] sm:$0xff]   ;;  %vm1189_vm3 = vcmask 80896   ;;  %s1417_s17 = sshll.u32 %s2291_s22, 2 }
   0xf   : > { %1679 = vmatprep.subr.bf16.mxu1 %v1914_v1  ;;  %1689 = vmatprep.mubr.msk.bf16.mxu1 %vm1915_vm1, %v1914_v1  ;;  %s245_s16 = scalar_lea.vmem %s2283_s0, %s1584_s11  ;;  %v1858_v19 = vld [vmem:[%s2284_s1 + $0x28] ss:$0 sps:$4 sm:$0x33]   ;;  %v1855_v21 = vld [vmem:[%s2284_s1 + $0x2c] sm:$0xff]   ;;  %v1860_v27 = vld [vmem:[%s2284_s1 + $0x20] sm:$0xff]   ;;  %s249_s24 = scalar_lea.vmem %s2289_s6, %s1417_s17  ;;  %vm1351_vm4 = vcmask 649216  }
  0x10   : > { %v2002_v11 = vld [vmem:[%s245_s16] sm:$0x7f]   ;;  %v1859_v22 = vld [vmem:[%s2285_s2 + $0x28] ss:$0 sps:$4 sm:$0x33]   ;;  %v1856_v23 = vld [vmem:[%s2285_s2 + $0x2c] sm:$0xff]  }
  0x11   : > { %1664 = vmatpush3.bf16.msra.mxu0 %v1847_v5  ;;  %v293_v12 = vshrl.u32 %v2002_v11, 16  ;;  %v295_v13 = vshll.u32 %v2002_v11, 16  ;;  %v506_v25 = vsel %vm336_vm0, %v1858_v19, 0  ;;  %v583_v26 = vsel %vm336_vm0, %v1859_v22, 0  ;;  %v1861_v28 = vld [vmem:[%s2285_s2 + $0x20] sm:$0xff]   ;;  %v1862_v29 = vld [vmem:[%s2284_s1 + $0x18] sm:$0xff]  }
  0x12   : > { %1680 = vmatpush3.bf16.msra.mxu1 %v1848_v6  ;;  %1665 = vmatprep.subr.bf16.mxu0 %v1914_v1  ;;  %v1863_v30 = vld [vmem:[%s2285_s2 + $0x18] sm:$0xff]   ;;  %v1864_v31 = vld [vmem:[%s2284_s1 + $0x10] sm:$0xff]   ;;  %v1866_v33 = vld [vmem:[%s2284_s1 + $0x8] sm:$0xff]   ;;  %v638_v53 = vrot.slane %v2002_v11, 1  ;;  %vm1352_vm5 = vsmask.f32 2304 }
  0x13   : > { %1681 = vmatprep.subr.bf16.mxu1 %v1914_v1  ;;  %v824_v16 = vrot.slane %v293_v12, 1  ;;  %v825_v17 = vrot.slane %v295_v13, 2  ;;  %v297_v18 = vrot.slane %v295_v13, 1  ;;  %v1865_v32 = vld [vmem:[%s2285_s2 + $0x10] sm:$0xff]   ;;  %v1867_v34 = vld [vmem:[%s2285_s2 + $0x8] sm:$0xff]   ;;  %v1868_v36 = vld [vmem:[%s2284_s1] sm:$0xff]  }
  0x14   : > { %v1870_v35 = vld [vmem:[%s2284_s1 + $0x80] ss:$0 sps:$4 sm:$0x33]   ;;  %v1872_v41 = vld [vmem:[%s2284_s1 + $0x78] sm:$0xff]   ;;  %v1874_v43 = vld [vmem:[%s2284_s1 + $0x70] sm:$0xff]  }
  0x15   : > { %1666 = vmatpush3.bf16.msra.mxu0 %v1849_v7  ;;  %v2018_v20 = vor.u32 %v825_v17, %v824_v16  ;;  %v298_v24 = vor.u32 %v297_v18, %v293_v12  ;;  %v1871_v37 = vld [vmem:[%s2285_s2 + $0x80] ss:$0 sps:$4 sm:$0x33]   ;;  %v676_v39 = vsel %vm336_vm0, %v1870_v35, 0  ;;  %v1873_v42 = vld [vmem:[%s2285_s2 + $0x78] sm:$0xff]   ;;  %v1875_v44 = vld [vmem:[%s2285_s2 + $0x70] sm:$0xff]  }
  0x16   : > { %1682 = vmatpush3.bf16.msra.mxu1 %v1850_v8  ;;  %1667 = vmatprep.subr.bf16.mxu0 %v1914_v1  ;;  %v1869_v38 = vld [vmem:[%s2285_s2] sm:$0xff]   ;;  %v765_v40 = vsel %vm336_vm0, %v1871_v37, 0  ;;  %v1876_v45 = vld [vmem:[%s2284_s1 + $0x68] sm:$0xff]   ;;  %v1880_v49 = vld [vmem:[%s2284_s1 + $0x58] sm:$0xff]   ;;  %v1012_v18 = vrot.slane %v2002_v11, 2 }
  0x17   : > { %1683 = vmatprep.subr.bf16.mxu1 %v1914_v1  ;;  %v1877_v46 = vld [vmem:[%s2285_s2 + $0x68] sm:$0xff]   ;;  %v1878_v47 = vld [vmem:[%s2284_s1 + $0x60] sm:$0xff]   ;;  %v1881_v50 = vld [vmem:[%s2285_s2 + $0x58] sm:$0xff]  }
  0x18   : > { %v1879_v48 = vld [vmem:[%s2285_s2 + $0x60] sm:$0xff]   ;;  %v1882_v51 = vld [vmem:[%s2284_s1 + $0xac] ss:$0 sps:$4 sm:$0x33]   ;;  %v1888_v60 = vld [vmem:[%s2284_s1 + $0x94] sm:$0xff]  }
  0x19   : > { %1668 = vmatpush3.bf16.msra.mxu0 %v1851_v9  ;;  %v1883_v52 = vld [vmem:[%s2285_s2 + $0xac] ss:$0 sps:$4 sm:$0x33]   ;;  %v864_v54 = vsel %vm336_vm0, %v1882_v51, 0  ;;  %v1884_v56 = vld [vmem:[%s2284_s1 + $0xa4] sm:$0xff]   ;;  %v1886_v58 = vld [vmem:[%s2284_s1 + $0x9c] sm:$0xff]  }
  0x1a   : > { %1684 = vmatpush3.bf16.msra.mxu1 %v1852_v10  ;;  %1669 = vmatprep.subr.bf16.mxu0 %v1914_v1  ;;  %v953_v55 = vsel %vm336_vm0, %v1883_v52, 0  ;;  %v1885_v57 = vld [vmem:[%s2285_s2 + $0xa4] sm:$0xff]   ;;  %v1887_v59 = vld [vmem:[%s2285_s2 + $0x9c] sm:$0xff]   ;;  %v1889_v61 = vld [vmem:[%s2285_s2 + $0x94] sm:$0xff]  }
  0x1b   : > { %1685 = vmatprep.subr.bf16.mxu1 %v1914_v1  ;;  %v1890_v62 = vld [vmem:[%s2284_s1 + $0x8c] sm:$0xff]   ;;  %v1892_v0 = vld [vmem:[%s2284_s1 + $0x84] sm:$0xff]   ;;  %v1894_v3 = vld [vmem:[%s2284_s1 + $0xd8] ss:$0 sps:$4 sm:$0x33]  }
  0x1c   : > { %v1891_v63 = vld [vmem:[%s2285_s2 + $0x8c] sm:$0xff]   ;;  %v1893_v2 = vld [vmem:[%s2285_s2 + $0x84] sm:$0xff]   ;;  %v1895_v4 = vld [vmem:[%s2285_s2 + $0xd8] ss:$0 sps:$4 sm:$0x33]   ;;  %v1050_v5 = vsel %vm336_vm0, %v1894_v3, 0 }
  0x1d   : > { %1670 = vmatpush3.bf16.msra.mxu0 %v1853_v14  ;;  %v1139_v6 = vsel %vm336_vm0, %v1895_v4, 0  ;;  %v1896_v7 = vld [vmem:[%s2284_s1 + $0xd0] sm:$0xff]   ;;  %v1898_v9 = vld [vmem:[%s2284_s1 + $0xc8] sm:$0xff]   ;;  %v1900_v12 = vld [vmem:[%s2284_s1 + $0xc0] sm:$0xff]  }
  0x1e   : > { %1686 = vmatpush3.bf16.msra.mxu1 %v1854_v15  ;;  %1671 = vmatprep.subr.bf16.mxu0 %v1914_v1  ;;  %v1897_v8 = vld [vmem:[%s2285_s2 + $0xd0] sm:$0xff]   ;;  %v1899_v10 = vld [vmem:[%s2285_s2 + $0xc8] sm:$0xff]   ;;  %v1901_v13 = vld [vmem:[%s2285_s2 + $0xc0] sm:$0xff]  }
  0x1f   : > { %1687 = vmatprep.subr.bf16.mxu1 %v1914_v1  ;;  %v1902_v14 = vld [vmem:[%s2284_s1 + $0xb8] sm:$0xff]   ;;  %v1904_v16 = vld [vmem:[%s2284_s1 + $0xb0] sm:$0xff]   ;;  %vm1353_vm6 = vmand %vm1351_vm4, %vm1352_vm5 }
  0x20   : > { %v1903_v15 = vld [vmem:[%s2285_s2 + $0xb8] sm:$0xff]   ;;  %v1905_v17 = vld [vmem:[%s2285_s2 + $0xb0] sm:$0xff]  }
  0x21   : > { %1672 = vmatpush3.bf16.msra.mxu0 %v1855_v21 }
  0x22   : > { %1688 = vmatpush3.bf16.msra.mxu1 %v1856_v23  ;;  %1693 = vmatprep.subr.bf16.mxu0 %v1914_v1 }
  0x23   : > { %1709 = vmatprep.subr.bf16.mxu1 %v1914_v1 }
  0x24   : > { %1674 = vmatmul.mubr.msk.bf16.vlgmr.msra.gmra.mxu0 %vm332_vm2, %v298_v24 }
  0x25   : > { %1690 = vmatmul.mubr.msk.bf16.vlgmr.msra.gmra.mxu1 %vm332_vm2, %v298_v24  ;;  %1694 = vmatpush3.bf16.msra.mxu0 %v506_v25 }
  0x26   : > { %1710 = vmatpush3.bf16.msra.mxu1 %v583_v26  ;;  %1695 = vmatprep.subr.bf16.mxu0 %v1914_v1 }
  0x27   : > { %1711 = vmatprep.subr.bf16.mxu1 %v1914_v1  ;;  %1705 = vmatprep.mubr.msk.bf16.mxu0 %vm1915_vm1, %v1914_v1 }
  0x28   : > { %1721 = vmatprep.mubr.msk.bf16.mxu1 %vm1915_vm1, %v1914_v1 }
  0x29   : > { %1696 = vmatpush3.bf16.msra.mxu0 %v1860_v27 }
  0x2a   : > { %1712 = vmatpush3.bf16.msra.mxu1 %v1861_v28  ;;  %1697 = vmatprep.subr.bf16.mxu0 %v1914_v1 }
  0x2b   : > { %1713 = vmatprep.subr.bf16.mxu1 %v1914_v1 }
  0x2d   : > { %1698 = vmatpush3.bf16.msra.mxu0 %v1862_v29 }
  0x2e   : > { %1714 = vmatpush3.bf16.msra.mxu1 %v1863_v30  ;;  %1699 = vmatprep.subr.bf16.mxu0 %v1914_v1 }
  0x2f   : > { %1715 = vmatprep.subr.bf16.mxu1 %v1914_v1 }
  0x31   : > { %1700 = vmatpush3.bf16.msra.mxu0 %v1864_v31 }
  0x32   : > { %1716 = vmatpush3.bf16.msra.mxu1 %v1865_v32  ;;  %1701 = vmatprep.subr.bf16.mxu0 %v1914_v1 }
  0x33   : > { %1717 = vmatprep.subr.bf16.mxu1 %v1914_v1 }
  0x35   : > { %1702 = vmatpush3.bf16.msra.mxu0 %v1866_v33 }
  0x36   : > { %1718 = vmatpush3.bf16.msra.mxu1 %v1867_v34  ;;  %1703 = vmatprep.subr.bf16.mxu0 %v1914_v1 }
  0x37   : > { %1719 = vmatprep.subr.bf16.mxu1 %v1914_v1 }
  0x39   : > { %1704 = vmatpush3.bf16.msra.mxu0 %v1868_v36 }
  0x3a   : > { %1720 = vmatpush3.bf16.msra.mxu1 %v1869_v38  ;;  %1725 = vmatprep.subr.bf16.mxu0 %v1914_v1 }
  0x3b   : > { %1741 = vmatprep.subr.bf16.mxu1 %v1914_v1 }
  0x3c   : > { %1706 = vmatmul.mubr.msk.bf16.vlgmr.msra.gmra.mxu0 %vm332_vm2, %v2002_v11 }
  0x3d   : > { %1722 = vmatmul.mubr.msk.bf16.vlgmr.msra.gmra.mxu1 %vm332_vm2, %v2002_v11  ;;  %1726 = vmatpush3.bf16.msra.mxu0 %v676_v39 }
  0x3e   : > { %1742 = vmatpush3.bf16.msra.mxu1 %v765_v40  ;;  %1727 = vmatprep.subr.bf16.mxu0 %v1914_v1 }
  0x3f   : > { %1743 = vmatprep.subr.bf16.mxu1 %v1914_v1  ;;  %1737 = vmatprep.mubr.msk.bf16.mxu0 %vm1915_vm1, %v1914_v1 }
  0x40   : > { %1753 = vmatprep.mubr.msk.bf16.mxu1 %vm1915_vm1, %v1914_v1 }
  0x41   : > { %1728 = vmatpush3.bf16.msra.mxu0 %v1872_v41 }
  0x42   : > { %1744 = vmatpush3.bf16.msra.mxu1 %v1873_v42  ;;  %1729 = vmatprep.subr.bf16.mxu0 %v1914_v1 }
  0x43   : > { %1745 = vmatprep.subr.bf16.mxu1 %v1914_v1 }
  0x45   : > { %1730 = vmatpush3.bf16.msra.mxu0 %v1874_v43 }
  0x46   : > { %1746 = vmatpush3.bf16.msra.mxu1 %v1875_v44  ;;  %1731 = vmatprep.subr.bf16.mxu0 %v1914_v1 }
  0x47   : > { %1747 = vmatprep.subr.bf16.mxu1 %v1914_v1 }
  0x49   : > { %1732 = vmatpush3.bf16.msra.mxu0 %v1876_v45 }
  0x4a   : > { %1748 = vmatpush3.bf16.msra.mxu1 %v1877_v46  ;;  %1733 = vmatprep.subr.bf16.mxu0 %v1914_v1 }
  0x4b   : > { %1749 = vmatprep.subr.bf16.mxu1 %v1914_v1 }
  0x4d   : > { %1734 = vmatpush3.bf16.msra.mxu0 %v1878_v47 }
  0x4e   : > { %1750 = vmatpush3.bf16.msra.mxu1 %v1879_v48  ;;  %1735 = vmatprep.subr.bf16.mxu0 %v1914_v1 }
  0x4f   : > { %1751 = vmatprep.subr.bf16.mxu1 %v1914_v1 }
  0x51   : > { %1736 = vmatpush3.bf16.msra.mxu0 %v1880_v49 }
  0x52   : > { %1752 = vmatpush3.bf16.msra.mxu1 %v1881_v50  ;;  %1757 = vmatprep.subr.bf16.mxu0 %v1914_v1 }
  0x53   : > { %1773 = vmatprep.subr.bf16.mxu1 %v1914_v1 }
  0x54   : > { %1738 = vmatmul.mubr.msk.bf16.vlgmr.msra.gmra.mxu0 %vm332_vm2, %v638_v53 }
  0x55   : > { %1754 = vmatmul.mubr.msk.bf16.vlgmr.msra.gmra.mxu1 %vm332_vm2, %v638_v53  ;;  %1758 = vmatpush3.bf16.msra.mxu0 %v864_v54 }
  0x56   : > { %1774 = vmatpush3.bf16.msra.mxu1 %v953_v55  ;;  %1759 = vmatprep.subr.bf16.mxu0 %v1914_v1 }
  0x57   : > { %1775 = vmatprep.subr.bf16.mxu1 %v1914_v1  ;;  %1769 = vmatprep.mubr.msk.bf16.mxu0 %vm1915_vm1, %v1914_v1 }
  0x58   : > { %1785 = vmatprep.mubr.msk.bf16.mxu1 %vm1915_vm1, %v1914_v1 }
  0x59   : > { %1760 = vmatpush3.bf16.msra.mxu0 %v1884_v56 }
  0x5a   : > { %1776 = vmatpush3.bf16.msra.mxu1 %v1885_v57  ;;  %1761 = vmatprep.subr.bf16.mxu0 %v1914_v1 }
  0x5b   : > { %1777 = vmatprep.subr.bf16.mxu1 %v1914_v1 }
  0x5d   : > { %1762 = vmatpush3.bf16.msra.mxu0 %v1886_v58 }
  0x5e   : > { %1778 = vmatpush3.bf16.msra.mxu1 %v1887_v59  ;;  %1763 = vmatprep.subr.bf16.mxu0 %v1914_v1 }
  0x5f   : > { %1779 = vmatprep.subr.bf16.mxu1 %v1914_v1 }
  0x61   : > { %1764 = vmatpush3.bf16.msra.mxu0 %v1888_v60 }
  0x62   : > { %1780 = vmatpush3.bf16.msra.mxu1 %v1889_v61  ;;  %1765 = vmatprep.subr.bf16.mxu0 %v1914_v1 }
  0x63   : > { %1781 = vmatprep.subr.bf16.mxu1 %v1914_v1 }
  0x65   : > { %1766 = vmatpush3.bf16.msra.mxu0 %v1890_v62 }
  0x66   : > { %1782 = vmatpush3.bf16.msra.mxu1 %v1891_v63  ;;  %1767 = vmatprep.subr.bf16.mxu0 %v1914_v1 }
  0x67   : > { %1783 = vmatprep.subr.bf16.mxu1 %v1914_v1 }
  0x69   : > { %1768 = vmatpush3.bf16.msra.mxu0 %v1892_v0 }
  0x6a   : > { %1784 = vmatpush3.bf16.msra.mxu1 %v1893_v2  ;;  %1789 = vmatprep.subr.bf16.mxu0 %v1914_v1 }
  0x6b   : > { %1805 = vmatprep.subr.bf16.mxu1 %v1914_v1 }
  0x6c   : > { %1770 = vmatmul.mubr.msk.bf16.vlgmr.msra.gmra.mxu0 %vm332_vm2, %v2018_v20 }
  0x6d   : > { %1786 = vmatmul.mubr.msk.bf16.vlgmr.msra.gmra.mxu1 %vm332_vm2, %v2018_v20  ;;  %1790 = vmatpush3.bf16.msra.mxu0 %v1050_v5 }
  0x6e   : > { %1806 = vmatpush3.bf16.msra.mxu1 %v1139_v6  ;;  %1791 = vmatprep.subr.bf16.mxu0 %v1914_v1 }
  0x6f   : > { %1807 = vmatprep.subr.bf16.mxu1 %v1914_v1  ;;  %1801 = vmatprep.mubr.msk.bf16.mxu0 %vm1915_vm1, %v1914_v1 }
  0x70   : > { %1817 = vmatprep.mubr.msk.bf16.mxu1 %vm1915_vm1, %v1914_v1 }
  0x71   : > { %1792 = vmatpush3.bf16.msra.mxu0 %v1896_v7 }
  0x72   : > { %1808 = vmatpush3.bf16.msra.mxu1 %v1897_v8  ;;  %1793 = vmatprep.subr.bf16.mxu0 %v1914_v1 }
  0x73   : > { %1809 = vmatprep.subr.bf16.mxu1 %v1914_v1 }
  0x75   : > { %1794 = vmatpush3.bf16.msra.mxu0 %v1898_v9 }
  0x76   : > { %1810 = vmatpush3.bf16.msra.mxu1 %v1899_v10  ;;  %1795 = vmatprep.subr.bf16.mxu0 %v1914_v1 }
  0x77   : > { %1811 = vmatprep.subr.bf16.mxu1 %v1914_v1 }
  0x79   : > { %1796 = vmatpush3.bf16.msra.mxu0 %v1900_v12 }
  0x7a   : > { %1812 = vmatpush3.bf16.msra.mxu1 %v1901_v13  ;;  %1797 = vmatprep.subr.bf16.mxu0 %v1914_v1 }
  0x7b   : > { %1813 = vmatprep.subr.bf16.mxu1 %v1914_v1 }
  0x7d   : > { %1798 = vmatpush3.bf16.msra.mxu0 %v1902_v14  ;;  %v1188_v14 = vld [vmem:[%s2286_s3] sm:$0x1f] }
  0x7e   : > { %1814 = vmatpush3.bf16.msra.mxu1 %v1903_v15  ;;  %1799 = vmatprep.subr.bf16.mxu0 %v1914_v1  ;;  %v1266_v15 = vld [vmem:[%s2287_s4] sm:$0x1f] }
  0x7f   : > { %1815 = vmatprep.subr.bf16.mxu1 %v1914_v1 }
  0x81   : > { %1800 = vmatpush3.bf16.msra.mxu0 %v1904_v16 }
  0x82   : > { %1816 = vmatpush3.bf16.msra.mxu1 %v1905_v17  ;;  %1821 = vmatprep.subr.mxu0 %v1914_v1 }
  0x83   : > { %1828 = vmatprep.subr.mxu1 %v1914_v1 }
  0x84   : > { %1802 = vmatmul.mubr.msk.bf16.vlgmr.msra.gmra.mxu0 %vm332_vm2, %v1012_v18 }
  0x85   : > { %1818 = vmatmul.mubr.msk.bf16.vlgmr.msra.gmra.mxu1 %vm332_vm2, %v1012_v18  ;;  %1825 = vmatprep.mubr.msk.f32.mxu0 %vm1915_vm1, %v1914_v1  ;;  %v1581_v18 = vld [vmem:[%s2288_s5] ss:$0 sm:$0xff] }
  0x86   : > { %1832 = vmatprep.mubr.msk.f32.mxu1 %vm1915_vm1, %v1914_v1 }
  0xe4   : > { %v374_v19 = vpop.f32.mrf.mxu0 }
  0xe5   : > { %v463_v20 = vpop.f32.mrf.mxu1 }
  0xe6   : > { %v1675_v21 = vpop.f32.mrf.mxu0 }
  0xe7   : > { %v1691_v11 = vpop.f32.mrf.mxu1 }
  0xe8   : > { %v377_v22 = vpop.f32.mrf.mxu0 }
  0xe9   : > { %v466_v23 = vpop.f32.mrf.mxu1 }
  0xea   : > { %v1676_v24 = vpop.f32.mrf.mxu0 }
  0xeb   : > { %v1692_v25 = vpop.f32.mrf.mxu1 }
  0xfc   : > { %v542_v26 = vpop.f32.mrf.mxu0 }
  0xfd   : > { %v543_v27 = vadd.f32 %v542_v26, %v374_v19  ;;  %v619_v28 = vpop.f32.mrf.mxu1 }
  0xfe   : > { %v620_v29 = vadd.f32 %v619_v28, %v463_v20  ;;  %v1707_v30 = vpop.f32.mrf.mxu0 }
  0xff   : > { %v1723_v31 = vpop.f32.mrf.mxu1 }
 0x100   : > { %v545_v32 = vpop.f32.mrf.mxu0 }
 0x101   : > { %v546_v33 = vadd.f32 %v545_v32, %v377_v22  ;;  %v622_v34 = vpop.f32.mrf.mxu1  ;;  %v1354_v22 = vld [vmem:[%s249_s24] sm:$0x7] }
 0x102   : > { %v623_v35 = vadd.f32 %v622_v34, %v466_v23  ;;  %v1708_v36 = vpop.f32.mrf.mxu0 }
 0x103   : > { %v1724_v37 = vpop.f32.mrf.mxu1 }
 0x114   : > { %v712_v38 = vpop.f32.mrf.mxu0 }
 0x115   : > { %v801_v39 = vpop.f32.mrf.mxu1  ;;  %v808_v54 = vadd.f32 %v712_v38, %v543_v27 }
 0x116   : > { %v1739_v40 = vpop.f32.mrf.mxu0  ;;  %v810_v55 = vadd.f32 %v801_v39, %v620_v29 }
 0x117   : > { %v1755_v41 = vpop.f32.mrf.mxu1 }
 0x118   : > { %v715_v42 = vpop.f32.mrf.mxu0 }
 0x119   : > { %v804_v43 = vpop.f32.mrf.mxu1  ;;  %v809_v59 = vadd.f32 %v715_v42, %v546_v33 }
 0x11a   : > { %v1740_v44 = vpop.f32.mrf.mxu0  ;;  %v811_v62 = vadd.f32 %v804_v43, %v623_v35 }
 0x11b   : > { %v1756_v45 = vpop.f32.mrf.mxu1 }
 0x12c   : > { %v900_v46 = vpop.f32.mrf.mxu0 }
 0x12d   : > { %v989_v47 = vpop.f32.mrf.mxu1  ;;  %v996_v56 = vadd.f32 %v900_v46, %v808_v54 }
 0x12e   : > { %v1771_v48 = vpop.f32.mrf.mxu0  ;;  %v998_v57 = vadd.f32 %v989_v47, %v810_v55 }
 0x12f   : > { %v1787_v49 = vpop.f32.mrf.mxu1 }
 0x130   : > { %v903_v50 = vpop.f32.mrf.mxu0 }
 0x131   : > { %v992_v51 = vpop.f32.mrf.mxu1  ;;  %v997_v2 = vadd.f32 %v903_v50, %v809_v59 }
 0x132   : > { %v1772_v52 = vpop.f32.mrf.mxu0  ;;  %v999_v4 = vadd.f32 %v992_v51, %v811_v62 }
 0x133   : > { %v1788_v53 = vpop.f32.mrf.mxu1 }
 0x144   : > { %v1086_v58 = vpop.f32.mrf.mxu0 }
 0x145   : > { %v1182_v60 = vadd.f32 %v1086_v58, %v996_v56  ;;  %v1175_v61 = vpop.f32.mrf.mxu1 }
 0x146   : > { %v1184_v63 = vadd.f32 %v1175_v61, %v998_v57  ;;  %v1803_v0 = vpop.f32.mrf.mxu0 }
 0x147   : > { %v1819_v3 = vpop.f32.mrf.mxu1 }
 0x148   : > { %v1186_v5 = vmax.f32 %v1182_v60, %v1184_v63  ;;  %v1089_v6 = vpop.f32.mrf.mxu0 }
 0x149   : > { %v1183_v7 = vadd.f32 %v1089_v6, %v997_v2  ;;  %v1178_v8 = vpop.f32.mrf.mxu1 }
 0x14a   : > { %v1185_v9 = vadd.f32 %v1178_v8, %v999_v4  ;;  %v1804_v10 = vpop.f32.mrf.mxu0 }
 0x14b   : > { %v1820_v12 = vpop.f32.mrf.mxu1 }
 0x14c   : > { %v1187_v13 = vmax.f32 %v1183_v7, %v1185_v9 }
 0x14e   : > { %1822 = vmatpush3.msk.msra.mxu0 %vm336_vm0, %v1187_v13  ;;  %1829 = vmatpush3.msk.msra.mxu1 %vm336_vm0, %v1187_v13 }
 0x14f   : > { %1823 = vmatprep.subr.mxu0 %v1914_v1  ;;  %1830 = vmatprep.subr.mxu1 %v1914_v1 }
 0x150   : > { %1824 = vmatpush3.msra.mxu0 %v1186_v5  ;;  %1831 = vmatpush3.msra.mxu1 %v1186_v5 }
 0x151   : > { %1826 = vmatmul.mubr.msk.f32.vlgmr.msra.gmra.mxu0 %vm1189_vm3, %v1188_v14  ;;  %1833 = vmatmul.mubr.msk.f32.vlgmr.msra.gmra.mxu1 %vm1189_vm3, %v1266_v15 }
 0x211   : > { %v1262_v16 = vpop.f32.mrf.mxu0  ;;  %v1336_v17 = vpop.f32.mrf.mxu1 }
 0x212   : > { %v1340_v19 = vmax.f32 %v1262_v16, %v1336_v17 }
 0x213   : > { %v1827_v20 = vpop.f32.mrf.mxu0  ;;  %v1834_v21 = vpop.f32.mrf.mxu1 }
 0x214   : > { %v1348_v11 = vadd.f32 %v1581_v18, %v1340_v19 }
 0x216   : > { %v1349_v1 = vmax.f32 %v1348_v11, 0.0 }
 0x218   : > { %v1350_v23 = vpack.c.bf16 %v1349_v1, %v1349_v1 }
 0x21a   : > { %v1355_v24 = vsel %vm1353_vm6, %v1350_v23, %v1354_v22 }
 0x21b   : > { %1356 = vst [vmem:[%s249_s24] sm:$0x7] %v1355_v24 }
 0x21c PF: > { %s16_s21 = sadd.s32 1, %s1912_s21  }
 0x21d   : > { %p13_p4 = scmp.ge.s32.totalorder %s16_s21, 4  }
 0x21f   :  { %15 = sbr.rel (!%p13_p4) target bundleno = 1 (0x1), region = 82 }

// kernel: convnet_forward.5
= control target key start
LH: loop header
LB: loop body
LE: loop exit
PB: predicated region body
PF: predicated region fallthrough
CT: control target
= control target key end

     0   :  { %v768_v1 = vmov 0   ;;  %v98_v20 = vlaneseq  ;;  %v769_v25 = vmov 1966171168   ;;  %vm421_vm0 = vcmask 1043456   ;;  %s970_s0 = inlined_call_operand.vmem [shape: bf16[2,400], index: 0, kind: input, shape index: {}]   ;;  %s971_s1 = inlined_call_operand.vmem [shape: bf16[400,120], index: 1, kind: input, shape index: {}]   ;;  %s972_s2 = inlined_call_operand.vmem [shape: f32[1,120], index: 2, kind: input, shape index: {}]   ;;  %s973_s3 = inlined_call_operand.vmem [shape: bf16[120,84], index: 3, kind: input, shape index: {}]   ;;  %s974_s4 = inlined_call_operand.vmem [shape: f32[1,84], index: 4, kind: input, shape index: {}]   ;;  %s975_s5 = inlined_call_operand.vmem [shape: bf16[84,10], index: 5, kind: input, shape index: {}]   ;;  %s976_s6 = inlined_call_operand.vmem [shape: f32[1,10], index: 6, kind: input, shape index: {}]   ;;  %s977_s7 = inlined_call_operand.hbm [shape: f32[2,10], index: 7, kind: output, shape index: {}]  }
   0x1   :  { %v707_v0 = vld [vmem:[%s971_s1 + $0x78] sm:$0xff]   ;;  %308 = vmatprep.subr.bf16.mxu1 %v768_v1  ;;  %v710_v4 = vld [vmem:[%s971_s1 + $0x70] sm:$0xff]   ;;  %v713_v7 = vld [vmem:[%s971_s1 + $0x68] sm:$0xff]   ;;  %v96_v26 = vunpack.c.l.s4 %v769_v25  ;;  %vm264_vm1 = vcmask 130048   ;;  %v770_v39 = vmov 0.0  }
   0x2   :  { %v708_v2 = vld [vmem:[%s971_s1 + $0xb8] sm:$0xff]   ;;  %628 = vmatprep.subr.bf16.mxu0 %v707_v0  ;;  %v711_v5 = vld [vmem:[%s971_s1 + $0xb0] sm:$0xff]   ;;  %v714_v8 = vld [vmem:[%s971_s1 + $0xa8] sm:$0xff]   ;;  %v99_v27 = vshrl.u32 %v98_v20, 7 }
   0x3   :  { %v709_v3 = vld [vmem:[%s971_s1 + $0x38] sm:$0xff]   ;;  %309 = vmatpush1.bf16.msra.mxu1 %v708_v2  ;;  %v712_v6 = vld [vmem:[%s971_s1 + $0x30] sm:$0xff]   ;;  %v715_v9 = vld [vmem:[%s971_s1 + $0x28] sm:$0xff]   ;;  %v97_v31 = vunpack.c.0.s8 %v96_v26 }
   0x4   :  { %629 = vmatpush3.bf16.msra.mxu0 %v709_v3  ;;  %310 = vmatprep.subr.bf16.mxu1 %v768_v1  ;;  %v716_v10 = vld [vmem:[%s971_s1 + $0x60] sm:$0xff]   ;;  %v719_v13 = vld [vmem:[%s971_s1 + $0x58] sm:$0xff]   ;;  %v722_v16 = vld [vmem:[%s971_s1 + $0x50] sm:$0xff]  }
   0x5   :  { %630 = vmatprep.subr.bf16.mxu0 %v710_v4  ;;  %v717_v11 = vld [vmem:[%s971_s1 + $0xa0] sm:$0xff]   ;;  %v720_v14 = vld [vmem:[%s971_s1 + $0x98] sm:$0xff]   ;;  %v723_v17 = vld [vmem:[%s971_s1 + $0x90] sm:$0xff]   ;;  %v100_v33 = vsub.s32 %v97_v31, %v99_v27 }
   0x6   :  { %v718_v12 = vld [vmem:[%s971_s1 + $0x20] sm:$0xff]   ;;  %v721_v15 = vld [vmem:[%s971_s1 + $0x18] sm:$0xff]   ;;  %v724_v18 = vld [vmem:[%s971_s1 + $0x10] sm:$0xff]  }
   0x7   :  { %311 = vmatpush1.bf16.msra.mxu1 %v711_v5  ;;  %v725_v19 = vld [vmem:[%s971_s1 + $0x48] sm:$0xff]   ;;  %v583_v23 = vld.sshfl [vmem:[%s970_s0] sm:$0x33 pattern:$0x75316420]  ;;  %v733_v41 = vld [vmem:[%s973_s3 + $0x30] sm:$0xff]  }
   0x8   :  { %631 = vmatpush3.bf16.msra.mxu0 %v712_v6  ;;  %312 = vmatprep.subr.bf16.mxu1 %v768_v1  ;;  %v726_v21 = vld [vmem:[%s971_s1 + $0x88] sm:$0xff]   ;;  %v728_v24 = vld [vmem:[%s971_s1 + $0x40] sm:$0xff]   ;;  %v732_v28 = vld [vmem:[%s973_s3 + $0x38] ss:$0 sps:$4 sm:$0xff]   ;;  %v94_v30 = vcombine.high %v583_v23, %v583_v23  ;;  %v101_v37 = vrot.slane %v583_v23, %v100_v33 }
   0x9   :  { %632 = vmatprep.subr.bf16.mxu0 %v713_v7  ;;  %v727_v22 = vld [vmem:[%s971_s1 + $0x8] sm:$0xff]   ;;  %v729_v29 = vld [vmem:[%s971_s1 + $0x80] sm:$0xff]   ;;  %v423_v35 = vsel %vm421_vm0, %v732_v28, 0 }
   0xa   :  { %v730_v32 = vld [vmem:[%s971_s1] sm:$0xff]   ;;  %v108_v36 = vrot.slane %v94_v30, %v100_v33  ;;  %v109_v40 = vcombine.high %v101_v37, %v101_v37 }
   0xb   :  { %313 = vmatpush1.bf16.msra.mxu1 %v714_v8  ;;  %v731_v34 = vld [vmem:[%s971_s1 + $0xc0] sm:$0xff]  }
   0xc   :  { %633 = vmatpush3.bf16.msra.mxu0 %v715_v9  ;;  %314 = vmatprep.subr.bf16.mxu1 %v768_v1  ;;  %v110_v38 = vcombine.high %v108_v36, %v108_v36 }
   0xd   :  { %634 = vmatprep.subr.bf16.mxu0 %v716_v10  ;;  %300 = vmatprep.mubr.bf16.mxu0 %v108_v36 }
   0xe   :  { %609 = vmatprep.mubr.msk.bf16.mxu1 %vm264_vm1, %v110_v38 }
   0xf   :  { %315 = vmatpush1.bf16.msra.mxu1 %v717_v11 }
  0x10   :  { %635 = vmatpush3.bf16.msra.mxu0 %v718_v12  ;;  %316 = vmatprep.subr.bf16.mxu1 %v768_v1 }
  0x11   :  { %636 = vmatprep.subr.bf16.mxu0 %v719_v13 }
  0x13   :  { %317 = vmatpush1.bf16.msra.mxu1 %v720_v14 }
  0x14   :  { %637 = vmatpush3.bf16.msra.mxu0 %v721_v15  ;;  %318 = vmatprep.subr.bf16.mxu1 %v768_v1 }
  0x15   :  { %638 = vmatprep.subr.bf16.mxu0 %v722_v16 }
  0x17   :  { %319 = vmatpush1.bf16.msra.mxu1 %v723_v17 }
  0x18   :  { %639 = vmatpush3.bf16.msra.mxu0 %v724_v18  ;;  %320 = vmatprep.subr.bf16.mxu1 %v768_v1 }
  0x19   :  { %640 = vmatprep.subr.bf16.mxu0 %v725_v19 }
  0x1b   :  { %321 = vmatpush1.bf16.msra.mxu1 %v726_v21 }
  0x1c   :  { %641 = vmatpush3.bf16.msra.mxu0 %v727_v22  ;;  %322 = vmatprep.subr.bf16.mxu1 %v768_v1 }
  0x1d   :  { %642 = vmatprep.subr.bf16.mxu0 %v728_v24 }
  0x1f   :  { %323 = vmatpush1.bf16.msra.mxu1 %v729_v29 }
  0x20   :  { %643 = vmatpush3.bf16.msra.mxu0 %v730_v32  ;;  %338 = vmatprep.subr.bf16.mxu1 %v768_v1 }
  0x21   :  { %666 = vmatprep.subr.bf16.mxu0 %v770_v39 }
  0x23   :  { %301 = vmatmul.mubr.bf16.vlgmr.msra.gmra.mxu0 %v101_v37  ;;  %339 = vmatpush2.bf16.msra.mxu1 %v731_v34 }
  0x24   :  { %667 = vmatpush3.bf16.msra.mxu0 %v423_v35 }
  0x25   :  { %12 = vsyncpa [#allocation3], 0  ;;  %668 = vmatprep.subr.bf16.mxu0 %v770_v39  ;;  %686 = vmatprep.subr.bf16.mxu1 %v770_v39  ;;  %v734_v42 = vld [vmem:[%s973_s3 + $0x28] sm:$0xff]   ;;  %v735_v43 = vld [vmem:[%s973_s3 + $0x20] sm:$0xff]   ;;  %vm771_vm2 = vmmov 0   ;;  %vm522_vm3 = vcmask 1041408  }
  0x26   :  { %341 = vmatmul.mubr.bf16.vlgmr.msra.gmra.mxu1 %v109_v40  ;;  %v736_v44 = vld [vmem:[%s973_s3 + $0x18] sm:$0xff]   ;;  %v737_v45 = vld [vmem:[%s973_s3 + $0x10] sm:$0xff]   ;;  %v738_v46 = vld [vmem:[%s973_s3 + $0x8] sm:$0xff]   ;;  %682 = vmatprep.mubr.msk.bf16.mxu0 %vm771_vm2, %v770_v39  ;;  %vm417_vm4 = vcmask 982016   ;;  %vm518_vm5 = vcmask 687104   ;;  %s772_s12 = smov [#allocation2]  }
  0x27   :  { %v739_v47 = vld [vmem:[%s973_s3] sm:$0xff]   ;;  %698 = vmatprep.mubr.msk.bf16.mxu1 %vm771_vm2, %v770_v39  ;;  %v740_v48 = vld [vmem:[%s975_s5 + $0x28] ss:$0 sps:$4 sm:$0x33]   ;;  %v742_v51 = vld [vmem:[%s975_s5 + $0x18] sm:$0xff]   ;;  %vm566_vm6 = vcmask 74752  }
  0x28   :  { %669 = vmatpush3.bf16.msra.mxu0 %v733_v41  ;;  %v524_v49 = vsel %vm522_vm3, %v740_v48, 0  ;;  %v741_v50 = vld [vmem:[%s975_s5 + $0x20] sm:$0xff]   ;;  %v743_v52 = vld [vmem:[%s975_s5 + $0x10] sm:$0xff]   ;;  %v744_v3 = vld [vmem:[%s975_s5 + $0x8] sm:$0xff]  }
  0x29   :  { %670 = vmatprep.subr.bf16.mxu0 %v770_v39  ;;  %687 = vmatpush3.bf16.msra.mxu1 %v524_v49  ;;  %v582_v55 = vld [vmem:[%s972_s2] ss:$0 sm:$0xff] }
  0x2a   :  { %688 = vmatprep.subr.bf16.mxu1 %v770_v39  ;;  %v745_v4 = vld [vmem:[%s975_s5] sm:$0xff]   ;;  %s574_s5 = sshll.u32 %s772_s12, 4  ;;  %s575_s5 = int_to_ptr.vmem [resolvable:$true] %s574_s5 }
  0x2b   :  { %v610_v5 = vld [vmem:[%s974_s4] ss:$0 sm:$0xff]  ;;  %s746_s4 = scalar_lea.vmem %s575_s5, 32  ;;  %p751_p1 = scmp.lt.s32.totalorder %s575_s5, %s575_s5 }
  0x2c   :  { %671 = vmatpush3.bf16.msra.mxu0 %v734_v42  ;;  %v620_v13 = vld [vmem:[%s976_s6] ss:$0 sm:$0xff]  ;;  %p747_p0 = scmp.ne.s32.totalorder %s575_s5, %s746_s4  ;;  %p752_p2 = scmp.lt.s32.totalorder %s746_s4, %s746_s4 }
  0x2d   :  { %672 = vmatprep.subr.bf16.mxu0 %v770_v39  ;;  %689 = vmatpush3.bf16.msra.mxu1 %v741_v50 }
  0x2e   :  { %690 = vmatprep.subr.bf16.mxu1 %v770_v39  ;;  %p753_p3 = por %p752_p2, %p751_p1 }
  0x30   :  { %673 = vmatpush3.bf16.msra.mxu0 %v735_v43  ;;  %p754_p4 = pnand %p753_p3, %p747_p0 }
  0x31   :  { %674 = vmatprep.subr.bf16.mxu0 %v770_v39  ;;  %691 = vmatpush3.bf16.msra.mxu1 %v742_v51 }
  0x32   :  { %692 = vmatprep.subr.bf16.mxu1 %v770_v39 }
  0x34   :  { %675 = vmatpush3.bf16.msra.mxu0 %v736_v44 }
  0x35   :  { %676 = vmatprep.subr.bf16.mxu0 %v770_v39  ;;  %693 = vmatpush3.bf16.msra.mxu1 %v743_v52 }
  0x36   :  { %694 = vmatprep.subr.bf16.mxu1 %v770_v39 }
  0x38   :  { %677 = vmatpush3.bf16.msra.mxu0 %v737_v45 }
  0x39   :  { %678 = vmatprep.subr.bf16.mxu0 %v770_v39  ;;  %695 = vmatpush3.bf16.msra.mxu1 %v744_v3 }
  0x3a   :  { %696 = vmatprep.subr.bf16.mxu1 %v770_v39 }
  0x3c   :  { %679 = vmatpush3.bf16.msra.mxu0 %v738_v46 }
  0x3d   :  { %680 = vmatprep.subr.bf16.mxu0 %v770_v39  ;;  %697 = vmatpush3.bf16.msra.mxu1 %v745_v4 }
  0x40   :  { %681 = vmatpush3.bf16.msra.mxu0 %v739_v47 }
  0xe3   :  { %v644_v53 = vpop.f32.mrf.mxu0 }
  0xe5   :  { %v645_v54 = vpop.f32.mrf.mxu0 }
  0xe6   :  { %v646_v56 = vadd.f32 %v645_v54, %v644_v53  ;;  %v342_v57 = vpop.f32.mrf.mxu1 }
  0xe7   :  { %v647_v58 = vpop.f32.mrf.mxu0 }
  0xe8   :  { %v303_v59 = vadd.f32 %v646_v56, %v582_v55  ;;  %v344_v60 = vpop.f32.mrf.mxu1 }
  0xe9   :  { %v648_v61 = vpop.f32.mrf.mxu0 }
  0xea   :  { %v343_v62 = vadd.f32 %v342_v57, %v303_v59  ;;  %v345_v63 = vpop.f32.mrf.mxu1 }
  0xec   :  { %v348_v0 = vmax.f32 %v343_v62, 0.0  ;;  %v346_v1 = vpop.f32.mrf.mxu1 }
  0xee   :  { %v349_v2 = vpack.c.bf16 %v348_v0, %v348_v0 }
  0xf0   :  { %683 = vmatmul.mubr.msk.bf16.vlgmr.msra.gmra.mxu0 %vm417_vm4, %v349_v2 }
 0x1b0   :  { %v459_v6 = vpop.f32.mrf.mxu0 }
 0x1b1   :  { %v460_v7 = vadd.f32 %v610_v5, %v459_v6 }
 0x1b2   :  { %v684_v8 = vpop.f32.mrf.mxu0 }
 0x1b3   :  { %v465_v9 = vmax.f32 %v460_v7, 0.0 }
 0x1b4   :  { %v462_v10 = vpop.f32.mrf.mxu0 }
 0x1b5   :  { %v466_v11 = vpack.c.bf16 %v465_v9, %v465_v9 }
 0x1b6   :  { %v685_v12 = vpop.f32.mrf.mxu0 }
 0x1b7   :  { %699 = vmatmul.mubr.msk.bf16.vlgmr.msra.gmra.mxu1 %vm518_vm5, %v466_v11 }
 0x277   :  { %v560_v14 = vpop.f32.mrf.mxu1 }
 0x278   :  { %v561_v15 = vadd.f32 %v620_v13, %v560_v14 }
 0x279   :  { %v700_v16 = vpop.f32.mrf.mxu1 }
 0x27a   :  { %567 = vst.msk [vmem:[#allocation2] sm:$0x3] %vm566_vm6, %v561_v15 }
 0x27b   :  { %v563_v17 = vpop.f32.mrf.mxu1 }
 0x27c   :  { %757 = shalt.err (!%p754_p4)
}
 0x27d   :  { %577 = dma.vmem_to_hbm [thread:$0]  %s575_s5, 32, %s977_s7, [#allocation3]   ;;  %v701_v18 = vpop.f32.mrf.mxu1 }
 0x27e   :  { %766 = dma.done.wait [#allocation3], 32  }
 0x27f   :  { %767 = vsyncadd [#allocation3], 4294967264 }
 0x280   :  { %581 = vsyncpa [#allocation3], 1 }

// kernel: convnet_forward.3
= control target key start
LH: loop header
LB: loop body
LE: loop exit
PB: predicated region body
PF: predicated region fallthrough
CT: control target
= control target key end

     0   :  { %11 = vsyncpa [#allocation3], 0  ;;  %s3596_s21 = smov 0   ;;  %s4069_s0 = inlined_call_operand.vmem [shape: bf16[2,96,32], index: 0, kind: input, shape index: {}]   ;;  %s4070_s1 = inlined_call_operand.vmem [shape: bf16[15,32,84], index: 1, kind: input, shape index: {}]   ;;  %s4071_s2 = inlined_call_operand.hbm [shape: bf16[15,32,84], index: 2, kind: input, shape index: {}]   ;;  %s4072_s3 = inlined_call_operand.vmem [shape: f32[14,28], index: 3, kind: input, shape index: {}]   ;;  %s4073_s4 = inlined_call_operand.vmem [shape: f32[14,28], index: 4, kind: input, shape index: {}]   ;;  %s4074_s5 = inlined_call_operand.vmem [shape: f32[1,84], index: 5, kind: input, shape index: {}]   ;;  %s4075_s6 = inlined_call_operand.vmem [shape: bf16[2,14,84], index: 6, kind: output, shape index: {}]  }
   0x1 LB: > { %s2832_s22 = sadd.s32 4294967295, %s3556_s21   ;;  %p2834_p0 = scmp.ge.s32.totalorder %s3556_s21, 1  ;;  %s3556_s21 = sphi %s3596_s21, %s17_s21  }
   0x2   : > { %p179_p1 = scmp.lt.s32.totalorder %s3556_s21, 3  ;;  %s3558_s23 = smov [#allocation2]  }
   0x3   : > { %s194_s24 = sshll.u32 %s3558_s23, 4  ;;  %p3441_p3 = scmp.eq.s32.totalorder %s2832_s22, 0  ;;  %s195_s24 = int_to_ptr.vmem [resolvable:$true] %s194_s24 }
   0x4   : > { %p3604_p2 = pnand %p2834_p0, %p179_p1  ;;  %s3531_s26 = scalar_lea.vmem %s195_s24, 3840 }
   0x5   : > { %p3532_p7 = scmp.ne.s32.totalorder %s195_s24, %s3531_s26  ;;  %p3539_p10 = scmp.lt.s32.totalorder %s195_s24, %s195_s24 }
   0x6   : > { %p3437_p4 = pneg %p3604_p2  ;;  %p3540_p11 = scmp.lt.s32.totalorder %s3531_s26, %s3531_s26 }
   0x8   : > { %p3438_p5 = pnand %p3441_p3, %p3437_p4  ;;  %p3541_p12 = por %p3540_p11, %p3539_p10 }
   0xa   : > { %p3522_p6 = pneg %p3438_p5 }
   0xc   : > { %p3534_p8 = pnand %p3532_p7, %p3522_p6 }
   0xe   : > { %p3535_p9 = pneg %p3534_p8 }
  0x10   : > { %p3542_p13 = pnand %p3541_p12, %p3535_p9 }
  0x12   : > { %3545 = shalt.err (!%p3542_p13)
}
  0x13   : > { %s3559_s27 = smov 64   ;;  %s3560_s28 = smov 4  }
  0x14   : > { %3440 = dma.hbm_to_vmem [thread:$0]  (!%p3438_p5), %s4071_s2, 3840, %s195_s24, [#allocation3], %s3559_s27, %s3559_s27, %s3560_s28  }
  0x15   : > { %227 = sbr.rel (%p3604_p2) target bundleno = 567 (0x237), region = 44 }
  0x1a   : > { %3551 = dma.done.wait (%p3441_p3), [#allocation3], 3840  }
  0x1b   : > { %3553 = vsyncadd (%p3441_p3), [#allocation3], 4294963456  ;;  %p257_p0 = scmp.lt.s32.totalorder %s2832_s22, 1  ;;  %v3454_v0 = vld [vmem:[%s4070_s1 + $0x18] sm:$0xff]   ;;  %v3456_v2 = vld [vmem:[%s4070_s1 + $0x10] sm:$0xff]   ;;  %vm331_vm1 = vcmask 261120  }
  0x1c   : > { %v3455_v1 = vld [vmem:[#allocation2 + $0x18] sm:$0xff]   ;;  %3170 = vmatprep.subr.bf16.mxu0 %v3454_v0  ;;  %v3457_v3 = vld [vmem:[#allocation2 + $0x10] sm:$0xff]   ;;  %v3460_v6 = vld [vmem:[%s4070_s1 + $0x8] sm:$0xff]   ;;  %vm303_vm0 = vsmask.f32 7424  ;;  %vm584_vm2 = vcmask 1046528  }
  0x1d   : > { %s4108_s22 = smov (!%p257_p0, %s2832_s22), 1  ;;  %3178 = vmatprep.subr.bf16.mxu1 %v3455_v1  ;;  %3171 = vmatpush3.bf16.msra.mxu0 %v3454_v0  ;;  %v3461_v11 = vld [vmem:[#allocation2 + $0x8] sm:$0xff]   ;;  %v3462_v16 = vld [vmem:[%s4070_s1] sm:$0xff]   ;;  %v3468_v30 = vld [vmem:[%s4070_s1 + $0x38] sm:$0xff]   ;;  %vm734_vm3 = vsmask.f32 6400 }
  0x1e   : > { %s3432_s7 = smul.u32 48, %s4108_s22  ;;  %3179 = vmatpush3.bf16.msra.mxu1 %v3455_v1  ;;  %3172 = vmatprep.subr.bf16.mxu0 %v3456_v2  ;;  %v3463_v18 = vld [vmem:[#allocation2] sm:$0xff]   ;;  %v3464_v19 = vld [vmem:[%s4070_s1 + $0x28] sm:$0xff]   ;;  %v3469_v31 = vld [vmem:[#allocation2 + $0x38] sm:$0xff]   ;;  %vm888_vm4 = vcmask 1045504   ;;  %vm2571_vm5 = vcmask 228352  }
  0x1f   : > { %3180 = vmatprep.subr.bf16.mxu1 %v3457_v3  ;;  %v3465_v20 = vld [vmem:[#allocation2 + $0x28] sm:$0xff]   ;;  %v3466_v23 = vld [vmem:[%s4070_s1 + $0x20] sm:$0xff]   ;;  %v3470_v34 = vld [vmem:[%s4070_s1 + $0x30] sm:$0xff]   ;;  %vm2578_vm6 = vcmask 1043456   ;;  %s3035_s16 = sshll.u32 %s4108_s22, 3  ;;  %vm2763_vm7 = vcmask 681984  }
  0x20   : > { %s3630_s14 = scalar_lea.vmem %s4069_s0, %s3432_s7  ;;  %v3467_v24 = vld [vmem:[#allocation2 + $0x20] sm:$0xff]   ;;  %v3471_v35 = vld [vmem:[#allocation2 + $0x30] sm:$0xff]   ;;  %v3472_v37 = vld [vmem:[%s4070_s1 + $0x48] sm:$0xff]   ;;  %s266_s18 = scalar_lea.vmem %s4075_s6, %s3035_s16  ;;  %vm2761_vm8 = vcmask 683008  }
  0x21   : > { %v3633_v4 = vld [vmem:[%s3630_s14] sm:$0xff]   ;;  %v3636_v5 = vld [vmem:[%s3630_s14 + $0x8] sm:$0xff]   ;;  %3173 = vmatpush3.bf16.msra.mxu0 %v3456_v2  ;;  %v3695_v44 = vld [vmem:[%s3630_s14 + $0x10] sm:$0xff]  }
  0x22   : > { %v305_v7 = vshrl.u32 %v3633_v4, 16  ;;  %v307_v8 = vshll.u32 %v3633_v4, 16  ;;  %v312_v9 = vshll.u32 %v3636_v5, 16  ;;  %v316_v10 = vshrl.u32 %v3636_v5, 16  ;;  %3181 = vmatpush3.bf16.msra.mxu1 %v3457_v3  ;;  %3186 = vmatprep.subr.bf16.mxu0 %v3460_v6  ;;  %v3473_v38 = vld [vmem:[#allocation2 + $0x48] sm:$0xff]   ;;  %v3474_v41 = vld [vmem:[%s4070_s1 + $0x40] sm:$0xff]  }
  0x23   : > { %3194 = vmatprep.subr.bf16.mxu1 %v3461_v11  ;;  %v585_v21 = vrot.slane %v3633_v4, 1  ;;  %v586_v22 = vrot.slane %v3636_v5, 1  ;;  %v889_v39 = vrot.slane %v3633_v4, 2  ;;  %v890_v40 = vrot.slane %v3636_v5, 2  ;;  %v3475_v42 = vld [vmem:[#allocation2 + $0x40] sm:$0xff]   ;;  %v3476_v45 = vld [vmem:[%s4070_s1 + $0x58] sm:$0xff]  }
  0x24   : > { %v309_v12 = vrot.slane %v307_v8, 1  ;;  %v314_v13 = vrot.slane %v312_v9, 1  ;;  %v735_v25 = vrot.slane %v305_v7, 1  ;;  %v739_v26 = vrot.slane %v312_v9, 2  ;;  %v3477_v46 = vld [vmem:[#allocation2 + $0x58] sm:$0xff]   ;;  %v3478_v47 = vld [vmem:[%s4070_s1 + $0x50] sm:$0xff]  }
  0x25   : > { %v587_v27 = vsel %vm584_vm2, %v585_v21, %v586_v22  ;;  %v736_v28 = vrot.slane %v307_v8, 2  ;;  %v738_v29 = vrot.slane %v316_v10, 1  ;;  %v891_v43 = vsel %vm888_vm4, %v889_v39, %v890_v40  ;;  %v3479_v49 = vld [vmem:[#allocation2 + $0x50] sm:$0xff]   ;;  %v3707_v50 = vld [vmem:[%s3630_s14 + $0x18] sm:$0xff]   ;;  %v3482_v54 = vld [vmem:[%s4070_s1 + $0x68] sm:$0xff]  }
  0x26   : > { %v310_v14 = vor.u32 %v309_v12, %v305_v7  ;;  %v318_v15 = vor.u32 %v316_v10, %v314_v13  ;;  %v1196_v48 = vshll.u32 %v3695_v44, 16  ;;  %v1194_v51 = vshrl.u32 %v3695_v44, 16  ;;  %v3483_v55 = vld [vmem:[#allocation2 + $0x68] sm:$0xff]   ;;  %v3721_v56 = vld [vmem:[%s3630_s14 + $0x20] sm:$0xff]   ;;  %v3486_v3 = vld [vmem:[%s4070_s1 + $0x78] sm:$0xff]  }
  0x27   : > { %v737_v32 = vor.u32 %v736_v28, %v735_v25  ;;  %v740_v33 = vor.u32 %v739_v26, %v738_v29  ;;  %v1200_v53 = vshll.u32 %v3707_v50, 16  ;;  %v3484_v57 = vld [vmem:[%s4070_s1 + $0x60] sm:$0xff]   ;;  %v3727_v61 = vld [vmem:[%s3630_s14 + $0x28] sm:$0xff]   ;;  %v1960_v62 = vshrl.u32 %v3721_v56, 16  ;;  %v3488_v12 = vld [vmem:[%s4070_s1 + $0x70] sm:$0xff]  }
  0x28   : > { %v315_v17 = vsel %vm303_vm0, %v310_v14, %v314_v13  ;;  %v1198_v52 = vrot.slane %v1196_v48, 1  ;;  %v3485_v58 = vld [vmem:[#allocation2 + $0x60] sm:$0xff]   ;;  %v1962_v63 = vshll.u32 %v3721_v56, 16  ;;  %v1966_v0 = vshll.u32 %v3727_v61, 16  ;;  %v3489_v13 = vld [vmem:[#allocation2 + $0x70] sm:$0xff]   ;;  %v3490_v28 = vld [vmem:[%s4070_s1 + $0x88] sm:$0xff]  }
  0x29   : > { %3174 = vmatprep.mubr.msk.bf16.mxu0 %vm331_vm1, %v315_v17  ;;  %3182 = vmatprep.mubr.msk.bf16.mxu1 %vm331_vm1, %v315_v17  ;;  %v741_v36 = vsel %vm734_vm3, %v737_v32, %v740_v33  ;;  %v1202_v60 = vrot.slane %v1200_v53, 1  ;;  %v1204_v2 = vshrl.u32 %v3707_v50, 16  ;;  %v1354_v9 = vrot.slane %v3707_v50, 1 }
  0x2a   : > { %3175 = vmatmul.mubr.msk.bf16.vlgmr.msra.gmra.mxu0 %vm331_vm1, %v318_v15  ;;  %3183 = vmatmul.mubr.msk.bf16.vlgmr.msra.gmra.mxu1 %vm331_vm1, %v318_v15  ;;  %v1199_v59 = vor.u32 %v1198_v52, %v1194_v51  ;;  %v3742_v7 = vrot.slane %v1966_v0, 1  ;;  %v2119_v10 = vrot.slane %v3721_v56, 1  ;;  %v1502_v14 = vrot.slane %v1194_v51, 1  ;;  %v3504_v51 = vld [vmem:[%s4070_s1 + $0xb8] sm:$0xff]  }
  0x2b   : > { %3187 = vmatpush3.bf16.msra.mxu0 %v3460_v6  ;;  %3195 = vmatpush3.bf16.msra.mxu1 %v3461_v11  ;;  %v1353_v6 = vrot.slane %v3695_v44, 1  ;;  %v1206_v11 = vor.u32 %v1204_v2, %v1202_v60  ;;  %v1970_v17 = vshrl.u32 %v3727_v61, 16  ;;  %v2269_v21 = vrot.slane %v1962_v63, 2  ;;  %v3505_v52 = vld [vmem:[#allocation2 + $0xb8] sm:$0xff]  }
  0x2c   : > { %3188 = vmatprep.subr.bf16.mxu0 %v3462_v16  ;;  %3196 = vmatprep.subr.bf16.mxu1 %v3463_v18  ;;  %v1203_v1 = vsel %vm303_vm0, %v1199_v59, %v1202_v60  ;;  %v1506_v25 = vrot.slane %v1200_v53, 2  ;;  %v2421_v29 = vrot.slane %v3721_v56, 2  ;;  %v3775_v32 = vrot.slane %v3727_v61, 2  ;;  %v3506_v53 = vld [vmem:[%s4070_s1 + $0xb0] sm:$0xff]   ;;  %v3511_v59 = vld [vmem:[#allocation2 + $0xc0] sm:$0xff]   ;;  %v3512_v60 = vld [vmem:[%s4070_s1 + $0xd8] sm:$0xff]  }
  0x2d   : > { %3190 = vmatprep.mubr.msk.bf16.mxu0 %vm331_vm1, %v3633_v4  ;;  %3198 = vmatprep.mubr.msk.bf16.mxu1 %vm331_vm1, %v3633_v4  ;;  %v3487_v4 = vld [vmem:[#allocation2 + $0x78] sm:$0xff]  }
  0x2f   : > { %3189 = vmatpush3.bf16.msra.mxu0 %v3462_v16  ;;  %3197 = vmatpush3.bf16.msra.mxu1 %v3463_v18  ;;  %v3756_v16 = vrot.slane %v3727_v61, 1  ;;  %v2268_v18 = vrot.slane %v1960_v62, 1 }
  0x30   : > { %3202 = vmatprep.subr.bf16.mxu0 %v3464_v19  ;;  %3210 = vmatprep.subr.bf16.mxu1 %v3465_v20 }
  0x31   : > { %v2270_v26 = vor.u32 %v2269_v21, %v2268_v18 }
  0x32   : > { %3191 = vmatmul.mubr.msk.bf16.vlgmr.msra.gmra.mxu0 %vm331_vm1, %v3636_v5  ;;  %3199 = vmatmul.mubr.msk.bf16.vlgmr.msra.gmra.mxu1 %vm331_vm1, %v3636_v5  ;;  %v1964_v5 = vrot.slane %v1962_v63, 1  ;;  %v3515_v63 = vld [vmem:[#allocation2 + $0xd0] sm:$0xff]  }
  0x33   : > { %3203 = vmatpush3.bf16.msra.mxu0 %v3464_v19  ;;  %3211 = vmatpush3.bf16.msra.mxu1 %v3465_v20  ;;  %v1503_v19 = vrot.slane %v1196_v48, 2  ;;  %v3761_v20 = vsel %vm584_vm2, %v2119_v10, %v3756_v16  ;;  %v3499_v48 = vld [vmem:[#allocation2 + $0xa8] sm:$0xff]  }
  0x34   : > { %3204 = vmatprep.subr.bf16.mxu0 %v3466_v23  ;;  %3212 = vmatprep.subr.bf16.mxu1 %v3467_v24  ;;  %v1965_v8 = vor.u32 %v1964_v5, %v1960_v62  ;;  %v3514_v62 = vld [vmem:[%s4070_s1 + $0xd0] sm:$0xff]   ;;  %v2657_v5 = vld [vmem:[%s4073_s4] sm:$0xff] }
  0x35   : > { %3206 = vmatprep.mubr.msk.bf16.mxu0 %vm331_vm1, %v587_v27  ;;  %3214 = vmatprep.mubr.msk.bf16.mxu1 %vm331_vm1, %v587_v27  ;;  %v2272_v27 = vrot.slane %v1966_v0, 2  ;;  %v3516_v0 = vld [vmem:[%s4070_s1 + $0xe8] sm:$0xff]  }
  0x36   : > { %v3753_v15 = vsel %vm303_vm0, %v1965_v8, %v3742_v7 }
  0x37   : > { %3205 = vmatpush3.bf16.msra.mxu0 %v3466_v23  ;;  %3213 = vmatpush3.bf16.msra.mxu1 %v3467_v24  ;;  %v2271_v23 = vrot.slane %v1970_v17, 1  ;;  %v1355_v24 = vsel %vm584_vm2, %v1353_v6, %v1354_v9 }
  0x38   : > { %3218 = vmatprep.subr.bf16.mxu0 %v3468_v30  ;;  %3226 = vmatprep.subr.bf16.mxu1 %v3469_v31 }
  0x3a   : > { %3207 = vmatmul.mubr.msk.bf16.vlgmr.msra.gmra.mxu0 %vm331_vm1, %v586_v22  ;;  %3215 = vmatmul.mubr.msk.bf16.vlgmr.msra.gmra.mxu1 %vm331_vm1, %v586_v22  ;;  %v1505_v22 = vrot.slane %v1204_v2, 1  ;;  %v3518_v2 = vld [vmem:[%s4070_s1 + $0xe0] sm:$0xff]  }
  0x3b   : > { %3219 = vmatpush3.bf16.msra.mxu0 %v3468_v30  ;;  %3227 = vmatpush3.bf16.msra.mxu1 %v3469_v31  ;;  %v3491_v30 = vld [vmem:[#allocation2 + $0x88] sm:$0xff]   ;;  %v3772_v31 = vor.u32 %v2272_v27, %v2271_v23 }
  0x3c   : > { %3220 = vmatprep.subr.bf16.mxu0 %v3470_v34  ;;  %3228 = vmatprep.subr.bf16.mxu1 %v3471_v35 }
  0x3d   : > { %3222 = vmatprep.mubr.msk.bf16.mxu0 %vm331_vm1, %v741_v36  ;;  %3230 = vmatprep.mubr.msk.bf16.mxu1 %vm331_vm1, %v741_v36  ;;  %v3785_v36 = vsel %vm888_vm4, %v2421_v29, %v3775_v32 }
  0x3f   : > { %3221 = vmatpush3.bf16.msra.mxu0 %v3470_v34  ;;  %3229 = vmatpush3.bf16.msra.mxu1 %v3471_v35  ;;  %v1507_v34 = vor.u32 %v1506_v25, %v1505_v22  ;;  %v3781_v35 = vsel %vm734_vm3, %v2270_v26, %v3772_v31 }
  0x40   : > { %3234 = vmatprep.subr.bf16.mxu0 %v3472_v37  ;;  %3242 = vmatprep.subr.bf16.mxu1 %v3473_v38 }
  0x42   : > { %3223 = vmatmul.mubr.msk.bf16.vlgmr.msra.gmra.mxu0 %vm331_vm1, %v740_v33  ;;  %3231 = vmatmul.mubr.msk.bf16.vlgmr.msra.gmra.mxu1 %vm331_vm1, %v740_v33  ;;  %v1504_v33 = vor.u32 %v1503_v19, %v1502_v14 }
  0x43   : > { %3235 = vmatpush3.bf16.msra.mxu0 %v3472_v37  ;;  %3243 = vmatpush3.bf16.msra.mxu1 %v3473_v38  ;;  %v3492_v37 = vld [vmem:[%s4070_s1 + $0x80] sm:$0xff]  }
  0x44   : > { %3236 = vmatprep.subr.bf16.mxu0 %v3474_v41  ;;  %3244 = vmatprep.subr.bf16.mxu1 %v3475_v42  ;;  %v3493_v38 = vld [vmem:[#allocation2 + $0x80] sm:$0xff]   ;;  %v1508_v39 = vsel %vm734_vm3, %v1504_v33, %v1507_v34 }
  0x45   : > { %3238 = vmatprep.mubr.msk.bf16.mxu0 %vm331_vm1, %v891_v43  ;;  %3246 = vmatprep.mubr.msk.bf16.mxu1 %vm331_vm1, %v891_v43  ;;  %v1656_v43 = vrot.slane %v3707_v50, 2 }
  0x47   : > { %3237 = vmatpush3.bf16.msra.mxu0 %v3474_v41  ;;  %3245 = vmatpush3.bf16.msra.mxu1 %v3475_v42  ;;  %v3495_v41 = vld [vmem:[#allocation2 + $0x98] sm:$0xff]   ;;  %v1655_v42 = vrot.slane %v3695_v44, 2 }
  0x48   : > { %3250 = vmatprep.subr.bf16.mxu0 %v3476_v45  ;;  %3258 = vmatprep.subr.bf16.mxu1 %v3477_v46 }
  0x4a   : > { %3239 = vmatmul.mubr.msk.bf16.vlgmr.msra.gmra.mxu0 %vm331_vm1, %v890_v40  ;;  %3247 = vmatmul.mubr.msk.bf16.vlgmr.msra.gmra.mxu1 %vm331_vm1, %v890_v40  ;;  %v3494_v40 = vld [vmem:[%s4070_s1 + $0x98] sm:$0xff]  }
  0x4b   : > { %3251 = vmatpush3.bf16.msra.mxu0 %v3476_v45  ;;  %3259 = vmatpush3.bf16.msra.mxu1 %v3477_v46  ;;  %v3496_v45 = vld [vmem:[%s4070_s1 + $0x90] sm:$0xff]  }
  0x4c   : > { %3252 = vmatprep.subr.bf16.mxu0 %v3478_v47  ;;  %3260 = vmatprep.subr.bf16.mxu1 %v3479_v49  ;;  %v3497_v46 = vld [vmem:[#allocation2 + $0x90] sm:$0xff]  }
  0x4d   : > { %3254 = vmatprep.mubr.msk.bf16.mxu0 %vm331_vm1, %v3695_v44  ;;  %3262 = vmatprep.mubr.msk.bf16.mxu1 %vm331_vm1, %v3695_v44  ;;  %v3498_v44 = vld [vmem:[%s4070_s1 + $0xa8] sm:$0xff]  }
  0x4f   : > { %3253 = vmatpush3.bf16.msra.mxu0 %v3478_v47  ;;  %3261 = vmatpush3.bf16.msra.mxu1 %v3479_v49  ;;  %v1657_v47 = vsel %vm888_vm4, %v1655_v42, %v1656_v43  ;;  %v3500_v49 = vld [vmem:[%s4070_s1 + $0xa0] sm:$0xff]  }
  0x50   : > { %3266 = vmatprep.subr.bf16.mxu0 %v3482_v54  ;;  %3274 = vmatprep.subr.bf16.mxu1 %v3483_v55 }
  0x52   : > { %3255 = vmatmul.mubr.msk.bf16.vlgmr.msra.gmra.mxu0 %vm331_vm1, %v3707_v50  ;;  %3263 = vmatmul.mubr.msk.bf16.vlgmr.msra.gmra.mxu1 %vm331_vm1, %v3707_v50  ;;  %v3501_v50 = vld [vmem:[#allocation2 + $0xa0] sm:$0xff]  }
  0x53   : > { %3267 = vmatpush3.bf16.msra.mxu0 %v3482_v54  ;;  %3275 = vmatpush3.bf16.msra.mxu1 %v3483_v55  ;;  %v3507_v54 = vld [vmem:[#allocation2 + $0xb0] sm:$0xff]   ;;  %v3508_v55 = vld [vmem:[%s4070_s1 + $0xc8] sm:$0xff]  }
  0x54   : > { %3268 = vmatprep.subr.bf16.mxu0 %v3484_v57  ;;  %3276 = vmatprep.subr.bf16.mxu1 %v3485_v58 }
  0x55   : > { %3270 = vmatprep.mubr.msk.bf16.mxu0 %vm331_vm1, %v1203_v1  ;;  %3278 = vmatprep.mubr.msk.bf16.mxu1 %vm331_vm1, %v1203_v1  ;;  %v3517_v1 = vld [vmem:[#allocation2 + $0xe8] sm:$0xff]  }
  0x57   : > { %3269 = vmatpush3.bf16.msra.mxu0 %v3484_v57  ;;  %3277 = vmatpush3.bf16.msra.mxu1 %v3485_v58  ;;  %v1972_v57 = vor.u32 %v1970_v17, %v3742_v7  ;;  %v3510_v58 = vld [vmem:[%s4070_s1 + $0xc0] sm:$0xff]  }
  0x58   : > { %3282 = vmatprep.subr.bf16.mxu0 %v3486_v3  ;;  %3290 = vmatprep.subr.bf16.mxu1 %v3487_v4 }
  0x5a   : > { %3271 = vmatmul.mubr.msk.bf16.vlgmr.msra.gmra.mxu0 %vm331_vm1, %v1206_v11  ;;  %3279 = vmatmul.mubr.msk.bf16.vlgmr.msra.gmra.mxu1 %vm331_vm1, %v1206_v11 }
  0x5b   : > { %3283 = vmatpush3.bf16.msra.mxu0 %v3486_v3  ;;  %3291 = vmatpush3.bf16.msra.mxu1 %v3487_v4  ;;  %v3519_v3 = vld [vmem:[#allocation2 + $0xe0] sm:$0xff]  }
  0x5c   : > { %3284 = vmatprep.subr.bf16.mxu0 %v3488_v12  ;;  %3292 = vmatprep.subr.bf16.mxu1 %v3489_v13  ;;  %v2569_v4 = vld [vmem:[%s4072_s3] sm:$0xff] }
  0x5d   : > { %3286 = vmatprep.mubr.msk.bf16.mxu0 %vm331_vm1, %v1355_v24  ;;  %3294 = vmatprep.mubr.msk.bf16.mxu1 %vm331_vm1, %v1355_v24 }
  0x5f   : > { %3285 = vmatpush3.bf16.msra.mxu0 %v3488_v12  ;;  %3293 = vmatpush3.bf16.msra.mxu1 %v3489_v13 }
  0x60   : > { %3298 = vmatprep.subr.bf16.mxu0 %v3490_v28  ;;  %3306 = vmatprep.subr.bf16.mxu1 %v3491_v30 }
  0x62   : > { %3287 = vmatmul.mubr.msk.bf16.vlgmr.msra.gmra.mxu0 %vm331_vm1, %v1354_v9  ;;  %3295 = vmatmul.mubr.msk.bf16.vlgmr.msra.gmra.mxu1 %vm331_vm1, %v1354_v9 }
  0x63   : > { %3299 = vmatpush3.bf16.msra.mxu0 %v3490_v28  ;;  %3307 = vmatpush3.bf16.msra.mxu1 %v3491_v30 }
  0x64   : > { %3300 = vmatprep.subr.bf16.mxu0 %v3492_v37  ;;  %3308 = vmatprep.subr.bf16.mxu1 %v3493_v38 }
  0x65   : > { %3302 = vmatprep.mubr.msk.bf16.mxu0 %vm331_vm1, %v1508_v39  ;;  %3310 = vmatprep.mubr.msk.bf16.mxu1 %vm331_vm1, %v1508_v39 }
  0x67   : > { %3301 = vmatpush3.bf16.msra.mxu0 %v3492_v37  ;;  %3309 = vmatpush3.bf16.msra.mxu1 %v3493_v38 }
  0x68   : > { %3314 = vmatprep.subr.bf16.mxu0 %v3494_v40  ;;  %3322 = vmatprep.subr.bf16.mxu1 %v3495_v41 }
  0x6a   : > { %3303 = vmatmul.mubr.msk.bf16.vlgmr.msra.gmra.mxu0 %vm331_vm1, %v1507_v34  ;;  %3311 = vmatmul.mubr.msk.bf16.vlgmr.msra.gmra.mxu1 %vm331_vm1, %v1507_v34 }
  0x6b   : > { %3315 = vmatpush3.bf16.msra.mxu0 %v3494_v40  ;;  %3323 = vmatpush3.bf16.msra.mxu1 %v3495_v41 }
  0x6c   : > { %3316 = vmatprep.subr.bf16.mxu0 %v3496_v45  ;;  %3324 = vmatprep.subr.bf16.mxu1 %v3497_v46 }
  0x6d   : > { %3318 = vmatprep.mubr.msk.bf16.mxu0 %vm331_vm1, %v1657_v47  ;;  %3326 = vmatprep.mubr.msk.bf16.mxu1 %vm331_vm1, %v1657_v47 }
  0x6f   : > { %3317 = vmatpush3.bf16.msra.mxu0 %v3496_v45  ;;  %3325 = vmatpush3.bf16.msra.mxu1 %v3497_v46 }
  0x70   : > { %3330 = vmatprep.subr.bf16.mxu0 %v3498_v44  ;;  %3338 = vmatprep.subr.bf16.mxu1 %v3499_v48 }
  0x72   : > { %3319 = vmatmul.mubr.msk.bf16.vlgmr.msra.gmra.mxu0 %vm331_vm1, %v1656_v43  ;;  %3327 = vmatmul.mubr.msk.bf16.vlgmr.msra.gmra.mxu1 %vm331_vm1, %v1656_v43 }
  0x73   : > { %3331 = vmatpush3.bf16.msra.mxu0 %v3498_v44  ;;  %3339 = vmatpush3.bf16.msra.mxu1 %v3499_v48 }
  0x74   : > { %3332 = vmatprep.subr.bf16.mxu0 %v3500_v49  ;;  %3340 = vmatprep.subr.bf16.mxu1 %v3501_v50 }
  0x75   : > { %3334 = vmatprep.mubr.msk.bf16.mxu0 %vm331_vm1, %v3721_v56  ;;  %3342 = vmatprep.mubr.msk.bf16.mxu1 %vm331_vm1, %v3721_v56  ;;  %v3509_v56 = vld [vmem:[#allocation2 + $0xc8] sm:$0xff]  }
  0x77   : > { %3333 = vmatpush3.bf16.msra.mxu0 %v3500_v49  ;;  %3341 = vmatpush3.bf16.msra.mxu1 %v3501_v50 }
  0x78   : > { %3346 = vmatprep.subr.bf16.mxu0 %v3504_v51  ;;  %3354 = vmatprep.subr.bf16.mxu1 %v3505_v52 }
  0x7a   : > { %3335 = vmatmul.mubr.msk.bf16.vlgmr.msra.gmra.mxu0 %vm331_vm1, %v3727_v61  ;;  %3343 = vmatmul.mubr.msk.bf16.vlgmr.msra.gmra.mxu1 %vm331_vm1, %v3727_v61  ;;  %v3513_v61 = vld [vmem:[#allocation2 + $0xd8] sm:$0xff]  }
  0x7b   : > { %3347 = vmatpush3.bf16.msra.mxu0 %v3504_v51  ;;  %3355 = vmatpush3.bf16.msra.mxu1 %v3505_v52 }
  0x7c   : > { %3348 = vmatprep.subr.bf16.mxu0 %v3506_v53  ;;  %3356 = vmatprep.subr.bf16.mxu1 %v3507_v54 }
  0x7d   : > { %3350 = vmatprep.mubr.msk.bf16.mxu0 %vm331_vm1, %v3753_v15  ;;  %3358 = vmatprep.mubr.msk.bf16.mxu1 %vm331_vm1, %v3753_v15 }
  0x7f   : > { %3349 = vmatpush3.bf16.msra.mxu0 %v3506_v53  ;;  %3357 = vmatpush3.bf16.msra.mxu1 %v3507_v54 }
  0x80   : > { %3362 = vmatprep.subr.bf16.mxu0 %v3508_v55  ;;  %3370 = vmatprep.subr.bf16.mxu1 %v3509_v56 }
  0x82   : > { %3351 = vmatmul.mubr.msk.bf16.vlgmr.msra.gmra.mxu0 %vm331_vm1, %v1972_v57  ;;  %3359 = vmatmul.mubr.msk.bf16.vlgmr.msra.gmra.mxu1 %vm331_vm1, %v1972_v57 }
  0x83   : > { %3363 = vmatpush3.bf16.msra.mxu0 %v3508_v55  ;;  %3371 = vmatpush3.bf16.msra.mxu1 %v3509_v56 }
  0x84   : > { %3364 = vmatprep.subr.bf16.mxu0 %v3510_v58  ;;  %3372 = vmatprep.subr.bf16.mxu1 %v3511_v59 }
  0x85   : > { %3366 = vmatprep.mubr.msk.bf16.mxu0 %vm331_vm1, %v3761_v20  ;;  %3374 = vmatprep.mubr.msk.bf16.mxu1 %vm331_vm1, %v3761_v20 }
  0x87   : > { %3365 = vmatpush3.bf16.msra.mxu0 %v3510_v58  ;;  %3373 = vmatpush3.bf16.msra.mxu1 %v3511_v59 }
  0x88   : > { %3378 = vmatprep.subr.bf16.mxu0 %v3512_v60  ;;  %3386 = vmatprep.subr.bf16.mxu1 %v3513_v61 }
  0x8a   : > { %3367 = vmatmul.mubr.msk.bf16.vlgmr.msra.gmra.mxu0 %vm331_vm1, %v3756_v16  ;;  %3375 = vmatmul.mubr.msk.bf16.vlgmr.msra.gmra.mxu1 %vm331_vm1, %v3756_v16 }
  0x8b   : > { %3379 = vmatpush3.bf16.msra.mxu0 %v3512_v60  ;;  %3387 = vmatpush3.bf16.msra.mxu1 %v3513_v61 }
  0x8c   : > { %3380 = vmatprep.subr.bf16.mxu0 %v3514_v62  ;;  %3388 = vmatprep.subr.bf16.mxu1 %v3515_v63 }
  0x8d   : > { %3382 = vmatprep.mubr.msk.bf16.mxu0 %vm331_vm1, %v3781_v35  ;;  %3390 = vmatprep.mubr.msk.bf16.mxu1 %vm331_vm1, %v3781_v35 }
  0x8f   : > { %3381 = vmatpush3.bf16.msra.mxu0 %v3514_v62  ;;  %3389 = vmatpush3.bf16.msra.mxu1 %v3515_v63 }
  0x90   : > { %3394 = vmatprep.subr.bf16.mxu0 %v3516_v0  ;;  %3402 = vmatprep.subr.bf16.mxu1 %v3517_v1 }
  0x92   : > { %3383 = vmatmul.mubr.msk.bf16.vlgmr.msra.gmra.mxu0 %vm331_vm1, %v3772_v31  ;;  %3391 = vmatmul.mubr.msk.bf16.vlgmr.msra.gmra.mxu1 %vm331_vm1, %v3772_v31 }
  0x93   : > { %3395 = vmatpush3.bf16.msra.mxu0 %v3516_v0  ;;  %3403 = vmatpush3.bf16.msra.mxu1 %v3517_v1 }
  0x94   : > { %3396 = vmatprep.subr.bf16.mxu0 %v3518_v2  ;;  %3404 = vmatprep.subr.bf16.mxu1 %v3519_v3 }
  0x95   : > { %3398 = vmatprep.mubr.msk.bf16.mxu0 %vm331_vm1, %v3785_v36  ;;  %3406 = vmatprep.mubr.msk.bf16.mxu1 %vm331_vm1, %v3785_v36 }
  0x97   : > { %3397 = vmatpush3.bf16.msra.mxu0 %v3518_v2  ;;  %3405 = vmatpush3.bf16.msra.mxu1 %v3519_v3 }
  0x9a   : > { %3399 = vmatmul.mubr.msk.bf16.vlgmr.msra.gmra.mxu0 %vm331_vm1, %v3775_v32  ;;  %3407 = vmatmul.mubr.msk.bf16.vlgmr.msra.gmra.mxu1 %vm331_vm1, %v3775_v32 }
  0x9b   : > { %3418 = vmatprep.mubr.msk.f32.mxu0 %vm2571_vm5, %v2569_v4  ;;  %3429 = vmatprep.mubr.msk.f32.mxu1 %vm2571_vm5, %v2657_v5 }
  0xea   : > { %v3176_v6 = vpop.f32.mrf.mxu0  ;;  %v3184_v7 = vpop.f32.mrf.mxu1 }
  0xec   : > { %v372_v8 = vpop.f32.mrf.mxu0  ;;  %v438_v9 = vpop.f32.mrf.mxu1 }
  0xee   : > { %v3177_v10 = vpop.f32.mrf.mxu0  ;;  %v3185_v11 = vpop.f32.mrf.mxu1 }
  0xf0   : > { %v375_v12 = vpop.f32.mrf.mxu0  ;;  %v441_v13 = vpop.f32.mrf.mxu1 }
  0xf2   : > { %v3192_v14 = vpop.f32.mrf.mxu0  ;;  %v3200_v15 = vpop.f32.mrf.mxu1 }
  0xf3   : > { %v512_v16 = vadd.f32 %v3192_v14, %v3176_v6  ;;  %v573_v17 = vadd.f32 %v3200_v15, %v3184_v7 }
  0xf4   : > { %v503_v18 = vpop.f32.mrf.mxu0  ;;  %v564_v19 = vpop.f32.mrf.mxu1 }
  0xf5   : > { %v504_v20 = vadd.f32 %v503_v18, %v372_v8  ;;  %v565_v21 = vadd.f32 %v564_v19, %v438_v9 }
  0xf6   : > { %v3193_v22 = vpop.f32.mrf.mxu0  ;;  %v3201_v23 = vpop.f32.mrf.mxu1 }
  0xf7   : > { %v515_v24 = vadd.f32 %v3193_v22, %v3177_v10  ;;  %v576_v25 = vadd.f32 %v3201_v23, %v3185_v11 }
  0xf8   : > { %v506_v26 = vpop.f32.mrf.mxu0  ;;  %v567_v27 = vpop.f32.mrf.mxu1 }
  0xf9   : > { %v507_v28 = vadd.f32 %v506_v26, %v375_v12  ;;  %v568_v29 = vadd.f32 %v567_v27, %v441_v13 }
  0xfa   : > { %v3208_v30 = vpop.f32.mrf.mxu0  ;;  %v3216_v31 = vpop.f32.mrf.mxu1 }
  0xfb   : > { %v723_v32 = vadd.f32 %v3208_v30, %v512_v16  ;;  %v727_v33 = vadd.f32 %v3216_v31, %v573_v17 }
  0xfc   : > { %v640_v34 = vpop.f32.mrf.mxu0  ;;  %v706_v35 = vpop.f32.mrf.mxu1 }
  0xfd   : > { %v721_v36 = vadd.f32 %v640_v34, %v504_v20  ;;  %v725_v37 = vadd.f32 %v706_v35, %v565_v21 }
  0xfe   : > { %v3209_v38 = vpop.f32.mrf.mxu0  ;;  %v3217_v39 = vpop.f32.mrf.mxu1 }
  0xff   : > { %v724_v40 = vadd.f32 %v3209_v38, %v515_v24  ;;  %v728_v41 = vadd.f32 %v3217_v39, %v576_v25 }
 0x100   : > { %v643_v42 = vpop.f32.mrf.mxu0  ;;  %v709_v43 = vpop.f32.mrf.mxu1 }
 0x101   : > { %v722_v45 = vadd.f32 %v643_v42, %v507_v28  ;;  %v726_v46 = vadd.f32 %v709_v43, %v568_v29 }
 0x102   : > { %v3224_v47 = vpop.f32.mrf.mxu0  ;;  %v3232_v44 = vpop.f32.mrf.mxu1 }
 0x103   : > { %v877_v48 = vadd.f32 %v3224_v47, %v723_v32  ;;  %v881_v49 = vadd.f32 %v3232_v44, %v727_v33 }
 0x104   : > { %v794_v50 = vpop.f32.mrf.mxu0  ;;  %v860_v51 = vpop.f32.mrf.mxu1 }
 0x105   : > { %v875_v52 = vadd.f32 %v794_v50, %v721_v36  ;;  %v879_v53 = vadd.f32 %v860_v51, %v725_v37 }
 0x106   : > { %v3225_v54 = vpop.f32.mrf.mxu0  ;;  %v3233_v55 = vpop.f32.mrf.mxu1 }
 0x107   : > { %v3889_v56 = vadd.f32 %v3225_v54, %v724_v40  ;;  %v3891_v57 = vadd.f32 %v3233_v55, %v728_v41 }
 0x108   : > { %v797_v58 = vpop.f32.mrf.mxu0  ;;  %v863_v59 = vpop.f32.mrf.mxu1 }
 0x109   : > { %v3893_v60 = vadd.f32 %v797_v58, %v722_v45  ;;  %v3895_v61 = vadd.f32 %v863_v59, %v726_v46 }
 0x10a   : > { %v3240_v62 = vpop.f32.mrf.mxu0  ;;  %v3248_v63 = vpop.f32.mrf.mxu1 }
 0x10b   : > { %v3897_v0 = vadd.f32 %v3240_v62, %v877_v48  ;;  %v3899_v1 = vadd.f32 %v3248_v63, %v881_v49 }
 0x10c   : > { %v944_v2 = vpop.f32.mrf.mxu0  ;;  %v1010_v3 = vpop.f32.mrf.mxu1 }
 0x10d   : > { %v3901_v4 = vadd.f32 %v944_v2, %v875_v52  ;;  %v3903_v5 = vadd.f32 %v1010_v3, %v879_v53 }
 0x10e   : > { %v3241_v6 = vpop.f32.mrf.mxu0  ;;  %v3249_v7 = vpop.f32.mrf.mxu1 }
 0x110   : > { %v3905_v8 = vpop.f32.mrf.mxu0  ;;  %v3907_v9 = vpop.f32.mrf.mxu1 }
 0x112   : > { %v3256_v10 = vpop.f32.mrf.mxu0  ;;  %v3264_v11 = vpop.f32.mrf.mxu1 }
 0x114   : > { %v1100_v12 = vpop.f32.mrf.mxu0  ;;  %v1166_v13 = vpop.f32.mrf.mxu1 }
 0x116   : > { %v3909_v14 = vpop.f32.mrf.mxu0  ;;  %v3911_v15 = vpop.f32.mrf.mxu1 }
 0x118   : > { %v3913_v16 = vpop.f32.mrf.mxu0  ;;  %v3915_v17 = vpop.f32.mrf.mxu1 }
 0x11a   : > { %v3272_v18 = vpop.f32.mrf.mxu0  ;;  %v3280_v19 = vpop.f32.mrf.mxu1 }
 0x11c   : > { %v1259_v20 = vpop.f32.mrf.mxu0  ;;  %v1325_v21 = vpop.f32.mrf.mxu1 }
 0x11e   : > { %v3917_v22 = vpop.f32.mrf.mxu0  ;;  %v3919_v23 = vpop.f32.mrf.mxu1 }
 0x120   : > { %v3921_v24 = vpop.f32.mrf.mxu0  ;;  %v3923_v25 = vpop.f32.mrf.mxu1 }
 0x122   : > { %v3288_v26 = vpop.f32.mrf.mxu0  ;;  %v3296_v27 = vpop.f32.mrf.mxu1 }
 0x124   : > { %v3925_v28 = vpop.f32.mrf.mxu0  ;;  %v3927_v29 = vpop.f32.mrf.mxu1 }
 0x126   : > { %v3929_v30 = vpop.f32.mrf.mxu0  ;;  %v3931_v31 = vpop.f32.mrf.mxu1 }
 0x128   : > { %v3933_v32 = vpop.f32.mrf.mxu0  ;;  %v3935_v33 = vpop.f32.mrf.mxu1 }
 0x12a   : > { %v3304_v34 = vpop.f32.mrf.mxu0  ;;  %v3312_v35 = vpop.f32.mrf.mxu1 }
 0x12c   : > { %v3937_v36 = vpop.f32.mrf.mxu0  ;;  %v3939_v37 = vpop.f32.mrf.mxu1 }
 0x12e   : > { %v3941_v38 = vpop.f32.mrf.mxu0  ;;  %v3943_v39 = vpop.f32.mrf.mxu1 }
 0x130   : > { %v3945_v40 = vpop.f32.mrf.mxu0  ;;  %v3947_v41 = vpop.f32.mrf.mxu1 }
 0x132   : > { %v3320_v42 = vpop.f32.mrf.mxu0  ;;  %v3328_v43 = vpop.f32.mrf.mxu1 }
 0x134   : > { %v3949_v45 = vpop.f32.mrf.mxu0  ;;  %v3951_v46 = vpop.f32.mrf.mxu1 }
 0x136   : > { %v3953_v47 = vpop.f32.mrf.mxu0  ;;  %v3955_v44 = vpop.f32.mrf.mxu1 }
 0x138   : > { %v3957_v48 = vpop.f32.mrf.mxu0  ;;  %v3959_v49 = vpop.f32.mrf.mxu1 }
 0x139   : > { %4077 = vst [vmem:[#allocation5_spill] sm:$0xff] %v3957_v48  ;;  %4078 = vst [vmem:[#allocation6_spill] sm:$0xff] %v3959_v49 }
 0x13a   : > { %v3961_v50 = vpop.f32.mrf.mxu0  ;;  %v3963_v51 = vpop.f32.mrf.mxu1 }
 0x13c   : > { %v3965_v52 = vpop.f32.mrf.mxu0  ;;  %v3967_v53 = vpop.f32.mrf.mxu1 }
 0x13d   : > { %4079 = vst [vmem:[#allocation7_spill] sm:$0xff] %v3967_v53 }
 0x13e   : > { %v3969_v54 = vpop.f32.mrf.mxu0  ;;  %v3971_v55 = vpop.f32.mrf.mxu1 }
 0x13f   : > { %4080 = vst [vmem:[#allocation8_spill] sm:$0xff] %v3969_v54  ;;  %4081 = vst [vmem:[#allocation9_spill] sm:$0xff] %v3971_v55  ;;  %v1028_v55 = vadd.f32 %v3241_v6, %v3889_v56 }
 0x140   : > { %v3973_v58 = vpop.f32.mrf.mxu0  ;;  %v3975_v59 = vpop.f32.mrf.mxu1 }
 0x141   : > { %4082 = vst [vmem:[#allocation10_spill] sm:$0xff] %v3973_v58  ;;  %4083 = vst [vmem:[#allocation11_spill] sm:$0xff] %v3975_v59  ;;  %v1183_v58 = vadd.f32 %v3256_v10, %v3897_v0  ;;  %v1187_v59 = vadd.f32 %v3264_v11, %v3899_v1  ;;  %v1030_v0 = vadd.f32 %v3907_v9, %v3895_v61 }
 0x142   : > { %v3977_v62 = vpop.f32.mrf.mxu0  ;;  %v3979_v63 = vpop.f32.mrf.mxu1  ;;  %v1184_v56 = vadd.f32 %v3909_v14, %v1028_v55 }
 0x143   : > { %4084 = vst [vmem:[#allocation12_spill] sm:$0xff] %v3977_v62  ;;  %4085 = vst [vmem:[#allocation13_spill] sm:$0xff] %v3979_v63  ;;  %v1032_v63 = vadd.f32 %v3249_v7, %v3891_v57 }
 0x144   : > { %v3981_v2 = vpop.f32.mrf.mxu0  ;;  %v3983_v3 = vpop.f32.mrf.mxu1 }
 0x145   : > { %4086 = vst [vmem:[#allocation14_spill] sm:$0xff] %v3981_v2  ;;  %4087 = vst [vmem:[#allocation15_spill] sm:$0xff] %v3983_v3  ;;  %v1342_v3 = vadd.f32 %v3272_v18, %v1183_v58  ;;  %v1188_v57 = vadd.f32 %v3911_v15, %v1032_v63  ;;  %v4095_v58 = vld [vmem:[#allocation5_spill] sm:$0xff] }
 0x146   : > { %v3985_v49 = vpop.f32.mrf.mxu0  ;;  %v3987_v48 = vpop.f32.mrf.mxu1  ;;  %v4097_v63 = vld [vmem:[#allocation8_spill] sm:$0xff] }
 0x147   : > { %4088 = vst [vmem:[#allocation16_spill] sm:$0xff] %v3985_v49  ;;  %4089 = vst [vmem:[#allocation17_spill] sm:$0xff] %v3987_v48  ;;  %v1181_v49 = vadd.f32 %v1100_v12, %v3901_v4  ;;  %v1185_v48 = vadd.f32 %v1166_v13, %v3903_v5  ;;  %v1491_v11 = vadd.f32 %v3288_v26, %v1342_v3  ;;  %v4098_v3 = vld [vmem:[#allocation9_spill] sm:$0xff] }
 0x148   : > { %v3989_v53 = vpop.f32.mrf.mxu0  ;;  %v3991_v54 = vpop.f32.mrf.mxu1  ;;  %v1186_v12 = vadd.f32 %v3915_v17, %v1030_v0  ;;  %v1343_v13 = vadd.f32 %v3917_v22, %v1184_v56 }
 0x149   : > { %4090 = vst [vmem:[#allocation18_spill] sm:$0xff] %v3989_v53  ;;  %4091 = vst [vmem:[#allocation19_spill] sm:$0xff] %v3991_v54  ;;  %v1346_v53 = vadd.f32 %v3280_v19, %v1187_v59  ;;  %v1026_v54 = vadd.f32 %v3905_v8, %v3893_v60  ;;  %v1340_v7 = vadd.f32 %v1259_v20, %v1181_v49  ;;  %v4096_v59 = vld [vmem:[#allocation6_spill] sm:$0xff] }
 0x14a   : > { %v3997_v62 = vpop.f32.mrf.mxu0  ;;  %v3999_v2 = vpop.f32.mrf.mxu1  ;;  %v1344_v10 = vadd.f32 %v1325_v21, %v1185_v48  ;;  %v1347_v60 = vadd.f32 %v3919_v23, %v1188_v57  ;;  %v1644_v15 = vadd.f32 %v3304_v34, %v1491_v11  ;;  %v1345_v20 = vadd.f32 %v3923_v25, %v1186_v12  ;;  %v4094_v55 = vld [vmem:[#allocation13_spill] sm:$0xff]  ;;  %v4102_v12 = vld [vmem:[#allocation11_spill] sm:$0xff] }
 0x14b   : > { %v1495_v4 = vadd.f32 %v3296_v27, %v1346_v53  ;;  %v1182_v5 = vadd.f32 %v3913_v16, %v1026_v54  ;;  %v1489_v9 = vadd.f32 %v3925_v28, %v1340_v7  ;;  %v1492_v16 = vadd.f32 %v3929_v30, %v1343_v13  ;;  %v4092_v53 = vld [vmem:[#allocation7_spill] sm:$0xff]  ;;  %v4093_v54 = vld [vmem:[#allocation12_spill] sm:$0xff] }
 0x14c   : > { %v2174_v1 = vpop.f32.mrf.mxu0  ;;  %v2240_v6 = vpop.f32.mrf.mxu1  ;;  %v1493_v14 = vadd.f32 %v3927_v29, %v1344_v10  ;;  %v1496_v17 = vadd.f32 %v3931_v31, %v1347_v60  ;;  %v1793_v27 = vadd.f32 %v3320_v42, %v1644_v15  ;;  %v1494_v34 = vadd.f32 %v3935_v33, %v1345_v20  ;;  %v4099_v56 = vld [vmem:[#allocation14_spill] sm:$0xff]  ;;  %v4100_v7 = vld [vmem:[#allocation15_spill] sm:$0xff] }
 0x14d   : > { %v1648_v18 = vadd.f32 %v3312_v35, %v1495_v4  ;;  %v1341_v19 = vadd.f32 %v3921_v24, %v1182_v5  ;;  %v1642_v23 = vadd.f32 %v3937_v36, %v1489_v9  ;;  %v1645_v24 = vadd.f32 %v3941_v38, %v1492_v16  ;;  %v4101_v4 = vld [vmem:[#allocation10_spill] sm:$0xff] }
 0x14e   : > { %v3369_v8 = vpop.f32.mrf.mxu0  ;;  %v3377_v61 = vpop.f32.mrf.mxu1  ;;  %v1646_v26 = vadd.f32 %v3939_v37, %v1493_v14  ;;  %v1649_v25 = vadd.f32 %v3943_v39, %v1496_v17  ;;  %v1949_v36 = vadd.f32 %v3961_v50, %v1793_v27  ;;  %v4103_v60 = vld [vmem:[#allocation16_spill] sm:$0xff]  ;;  %v4104_v14 = vld [vmem:[#allocation17_spill] sm:$0xff] }
 0x14f   : > { %v1797_v28 = vadd.f32 %v3328_v43, %v1648_v18  ;;  %v1490_v29 = vadd.f32 %v3933_v32, %v1341_v19  ;;  %v1791_v31 = vadd.f32 %v3949_v45, %v1642_v23  ;;  %v1647_v32 = vadd.f32 %v3947_v41, %v1494_v34 }
 0x150   : > { %v2177_v21 = vpop.f32.mrf.mxu0  ;;  %v2243_v22 = vpop.f32.mrf.mxu1  ;;  %v1795_v48 = vadd.f32 %v3951_v46, %v1646_v26  ;;  %v1794_v33 = vadd.f32 %v3953_v47, %v1645_v24  ;;  %v1798_v38 = vadd.f32 %v3955_v44, %v1649_v25  ;;  %v2108_v46 = vadd.f32 %v4093_v54, %v1949_v36  ;;  %v4105_v26 = vld [vmem:[#allocation18_spill] sm:$0xff] }
 0x151   : > { %v1953_v37 = vadd.f32 %v3963_v51, %v1797_v28  ;;  %v1643_v42 = vadd.f32 %v3945_v40, %v1490_v29  ;;  %v1947_v49 = vadd.f32 %v3965_v52, %v1791_v31  ;;  %v1796_v40 = vadd.f32 %v4096_v59, %v1647_v32  ;;  %v4106_v28 = vld [vmem:[#allocation19_spill] sm:$0xff] }
 0x152   : > { %v3384_v35 = vpop.f32.mrf.mxu0  ;;  %v3392_v30 = vpop.f32.mrf.mxu1  ;;  %v1951_v45 = vadd.f32 %v4092_v53, %v1795_v48  ;;  %v1950_v41 = vadd.f32 %v4097_v63, %v1794_v33  ;;  %v1954_v47 = vadd.f32 %v4098_v3, %v1798_v38  ;;  %v2257_v10 = vadd.f32 %v3997_v62, %v2108_v46  ;;  %v3030_v63 = vld [vmem:[%s4074_s5] ss:$0 sm:$0xff] }
 0x153   : > { %v2112_v50 = vadd.f32 %v4094_v55, %v1953_v37  ;;  %v1792_v51 = vadd.f32 %v4095_v58, %v1643_v42  ;;  %v2106_v57 = vadd.f32 %v4099_v56, %v1947_v49  ;;  %v1952_v13 = vadd.f32 %v4102_v12, %v1796_v40  ;;  %v2570_v58 = vld [vmem:[%s4072_s3 + $0x8] sm:$0x3f] }
 0x154   : > { %v2327_v43 = vpop.f32.mrf.mxu0  ;;  %v2393_v39 = vpop.f32.mrf.mxu1  ;;  %v2110_v52 = vadd.f32 %v4100_v7, %v1951_v45  ;;  %v2109_v9 = vadd.f32 %v4103_v60, %v1950_v41  ;;  %v2113_v15 = vadd.f32 %v4104_v14, %v1954_v47  ;;  %v2410_v17 = vadd.f32 %v3384_v35, %v2257_v10 }
 0x155   : > { %v2261_v11 = vadd.f32 %v3999_v2, %v2112_v50  ;;  %v1948_v5 = vadd.f32 %v4101_v4, %v1792_v51  ;;  %v2255_v20 = vadd.f32 %v2174_v1, %v2106_v57  ;;  %v2111_v62 = vadd.f32 %v4106_v28, %v1952_v13  ;;  %v2658_v51 = vld [vmem:[%s4073_s4 + $0x8] sm:$0x3f] }
 0x156   : > { %v3385_v0 = vpop.f32.mrf.mxu0  ;;  %v3393_v44 = vpop.f32.mrf.mxu1  ;;  %v2259_v16 = vadd.f32 %v2240_v6, %v2110_v52  ;;  %v2258_v29 = vadd.f32 %v3369_v8, %v2109_v9  ;;  %v2262_v2 = vadd.f32 %v3377_v61, %v2113_v15 }
 0x157   : > { %v2414_v23 = vadd.f32 %v3392_v30, %v2261_v11  ;;  %v2107_v27 = vadd.f32 %v4105_v26, %v1948_v5  ;;  %v2408_v25 = vadd.f32 %v2327_v43, %v2255_v20  ;;  %v2260_v42 = vadd.f32 %v2243_v22, %v2111_v62 }
 0x158   : > { %v2330_v18 = vpop.f32.mrf.mxu0  ;;  %v2396_v19 = vpop.f32.mrf.mxu1  ;;  %v2412_v31 = vadd.f32 %v2393_v39, %v2259_v16  ;;  %v2411_v32 = vadd.f32 %v3385_v0, %v2258_v29  ;;  %v2415_v6 = vadd.f32 %v3393_v44, %v2262_v2 }
 0x159   : > { %v2256_v37 = vadd.f32 %v2177_v21, %v2107_v27  ;;  %v2413_v8 = vadd.f32 %v2396_v19, %v2260_v42 }
 0x15a   : > { %v3400_v34 = vpop.f32.mrf.mxu0  ;;  %v3408_v24 = vpop.f32.mrf.mxu1 }
 0x15b   : > { %v2559_v48 = vadd.f32 %v3400_v34, %v2410_v17  ;;  %v2563_v36 = vadd.f32 %v3408_v24, %v2414_v23  ;;  %v2409_v49 = vadd.f32 %v2330_v18, %v2256_v37 }
 0x15c   : > { %v2476_v33 = vpop.f32.mrf.mxu0  ;;  %v2542_v1 = vpop.f32.mrf.mxu1 }
 0x15d   : > { %v2567_v35 = vmax.f32 %v2559_v48, %v2563_v36  ;;  %v2557_v30 = vadd.f32 %v2476_v33, %v2408_v25  ;;  %v2561_v38 = vadd.f32 %v2542_v1, %v2412_v31 }
 0x15e   : > { %v3401_v53 = vpop.f32.mrf.mxu0  ;;  %v3409_v45 = vpop.f32.mrf.mxu1 }
 0x15f   : > { %v2565_v61 = vmax.f32 %v2557_v30, %v2561_v38  ;;  %v2560_v54 = vadd.f32 %v3401_v53, %v2411_v32  ;;  %v2564_v46 = vadd.f32 %v3409_v45, %v2415_v6 }
 0x160   : > { %v2479_v43 = vpop.f32.mrf.mxu0  ;;  %v2545_v39 = vpop.f32.mrf.mxu1 }
 0x161   : > { %v2568_v55 = vmax.f32 %v2560_v54, %v2564_v46  ;;  %v2558_v21 = vadd.f32 %v2479_v43, %v2409_v49  ;;  %v2562_v22 = vadd.f32 %v2545_v39, %v2413_v8 }
 0x163   : > { %v2566_v50 = vmax.f32 %v2558_v21, %v2562_v22  ;;  %3410 = vmatprep.subr.msk.mxu0 %vm2578_vm6, %v2568_v55  ;;  %3421 = vmatprep.subr.msk.mxu1 %vm2578_vm6, %v2568_v55 }
 0x164   : > { %3411 = vmatpush3.msk.msra.mxu0 %vm2578_vm6, %v2568_v55  ;;  %3422 = vmatpush3.msk.msra.mxu1 %vm2578_vm6, %v2568_v55 }
 0x165   : > { %3412 = vmatprep.subr.mxu0 %v2567_v35  ;;  %3423 = vmatprep.subr.mxu1 %v2567_v35 }
 0x166   : > { %3413 = vmatpush3.msra.mxu0 %v2567_v35  ;;  %3424 = vmatpush3.msra.mxu1 %v2567_v35 }
 0x167   : > { %3414 = vmatprep.subr.mxu0 %v2566_v50  ;;  %3425 = vmatprep.subr.mxu1 %v2566_v50 }
 0x168   : > { %3415 = vmatpush3.msra.mxu0 %v2566_v50  ;;  %3426 = vmatpush3.msra.mxu1 %v2566_v50 }
 0x169   : > { %3416 = vmatprep.subr.mxu0 %v2565_v61  ;;  %3427 = vmatprep.subr.mxu1 %v2565_v61 }
 0x16a   : > { %3417 = vmatpush3.msra.mxu0 %v2565_v61  ;;  %3428 = vmatpush3.msra.mxu1 %v2565_v61 }
 0x16b   : > { %3419 = vmatmul.mubr.msk.f32.vlgmr.msra.gmra.mxu0 %vm2571_vm5, %v2570_v58  ;;  %3430 = vmatmul.mubr.msk.f32.vlgmr.msra.gmra.mxu1 %vm2571_vm5, %v2658_v51 }
 0x22b   : > { %v3420_v59 = vpop.f32.mrf.mxu0  ;;  %v3431_v40 = vpop.f32.mrf.mxu1 }
 0x22c   : > { %v2741_v41 = vmax.f32 %v3420_v59, %v3431_v40 }
 0x22d   : > { %v2648_v3 = vpop.f32.mrf.mxu0  ;;  %v2731_v47 = vpop.f32.mrf.mxu1 }
 0x22e   : > { %v2750_v0 = vadd.f32 %v3030_v63, %v2741_v41  ;;  %v2740_v44 = vmax.f32 %v2648_v3, %v2731_v47 }
 0x230   : > { %v2752_v56 = vmax.f32 %v2750_v0, 0.0  ;;  %v2749_v57 = vadd.f32 %v3030_v63, %v2740_v44 }
 0x232   : > { %v3037_v7 = vpack.c.bf16 %v2752_v56, %v2752_v56  ;;  %v2751_v52 = vmax.f32 %v2749_v57, 0.0 }
 0x234   : > { %2764 = vst.msk [vmem:[%s266_s18 + $0x4] sm:$0x7] %vm2763_vm7, %v3037_v7  ;;  %v3036_v10 = vpack.c.bf16 %v2751_v52, %v2751_v52 }
 0x236   : > { %2762 = vst.msk [vmem:[%s266_s18] sm:$0xf] %vm2761_vm8, %v3036_v10 }
 0x237 PF: > { %s17_s21 = sadd.s32 1, %s3556_s21  }
 0x238   : > { %p14_p1 = scmp.ge.s32.totalorder %s17_s21, 4  }
 0x23a   :  { %16 = sbr.rel (!%p14_p1) target bundleno = 1 (0x1), region = 107 }
 0x23f   :  { %2786 = vsyncpa [#allocation3], 1 }
 0x240   :  { %2788 = vsyncpa [#allocation3 + $0x1], 1 }

</bundles_post_ra>
